<compile_context>
chip_gen: v7x
topology: tpu7x:2x2x1
jax: 0.10.0
libtpu: 0.0.40
codegen_flags: <defaults>
</compile_context>

<pallas_src>
import jax
import jax.numpy as jnp
import numpy as np
from jax.experimental import pallas as pl
from jax.experimental.pallas import tpu as pltpu

# ----------------------------------------------------------------------------
# Synthetic ELMo config (shapes mirror the module's __init__; small values)
# ----------------------------------------------------------------------------
MAX_WORD_LENGTH = 50                      # ELMoCharacterMapper.max_word_length
CHAR_VOCAB = 262                          # 261 chars (+1 offset) + padding row 0
CHAR_EMBED_DIM = 16                       # char_cnn.embedding.dim
FILTERS = ((1, 32), (2, 32), (3, 64))     # char_cnn.filters -> n_filters = 128
N_FILTERS = sum(n for _, n in FILTERS)    # 128 (lane-dense)
MAX_FILTER_WIDTH = max(w for w, _ in FILTERS)          # 3
N_HIGHWAY = 2                             # char_cnn.n_highway
PROJECTION_DIM = 32                       # lstm.projection_dim (output_dim)

# Grouped-conv geometry: each MXU row holds 8 chars x 16 dims = 128 lanes and
# produces 6 adjacent conv outputs; 9 rows per token cover t = 0..53 >= 49.
WIN_CHARS = 128 // CHAR_EMBED_DIM                        # 8
OUT_PER_GROUP = WIN_CHARS - MAX_FILTER_WIDTH + 1         # 6
GROUPS = -(-MAX_WORD_LENGTH // OUT_PER_GROUP)            # 9
CHARS_PAD = OUT_PER_GROUP * (GROUPS - 1) + WIN_CHARS     # 56
GROUP_K = WIN_CHARS * CHAR_EMBED_DIM                     # 128
GROUP_N = OUT_PER_GROUP * N_FILTERS                      # 768

TOKENS_PER_TILE = 256   # keeps the f32 conv intermediate ~7 MB (v7x-safe)
NEG = -1e30             # additive time mask; conv intermediate stays f32

BOS_CHAR = 256
EOS_CHAR = 257
BOW_CHAR = 258
EOW_CHAR = 259
PAD_CHAR = 260


def _make_bos_eos(character):
    ids = [PAD_CHAR] * MAX_WORD_LENGTH
    ids[0] = BOW_CHAR
    ids[1] = character
    ids[2] = EOW_CHAR
    return np.array(ids, dtype=np.int32) + 1   # +1 offset as in the mapper


BOS_CHARS = jnp.asarray(_make_bos_eos(BOS_CHAR))
EOS_CHARS = jnp.asarray(_make_bos_eos(EOS_CHAR))


def _round_up(x, m):
    return (x + m - 1) // m * m


def _cdiv(a, b):
    return -(-a // b)


# ----------------------------------------------------------------------------
# Static (structural) tables: per-filter widths, time-validity mask per group.
# ----------------------------------------------------------------------------
def _filter_widths():
    w = np.zeros((N_FILTERS,), np.int32)
    off = 0
    for (width, num) in FILTERS:
        w[off:off + num] = width
        off += num
    return w


_WIDTHS = _filter_widths()


def _build_time_mask():
    m = np.zeros((GROUPS, GROUP_N), np.float32)
    for g in range(GROUPS):
        for o in range(OUT_PER_GROUP):
            t = g * OUT_PER_GROUP + o
            invalid = t > (MAX_WORD_LENGTH - _WIDTHS)      # width-w conv valid for t <= L - w
            m[g, o * N_FILTERS:(o + 1) * N_FILTERS] = np.where(invalid, NEG, 0.0)
    return m


_TIME_MASK = _build_time_mask()
_MASK_NEEDED = tuple(bool(np.any(_TIME_MASK[g] != 0.0)) for g in range(GROUPS))


# ----------------------------------------------------------------------------
# Deterministic parameter init (synthetic; no checkpoint load)
# ----------------------------------------------------------------------------
def init_params(key):
    keys = jax.random.split(key, 3 + 2 * len(FILTERS) + 2 * N_HIGHWAY + 2)
    it = iter(keys)
    params = {}

    emb = 0.1 * jax.random.normal(next(it), (CHAR_VOCAB, CHAR_EMBED_DIM), jnp.float32)
    emb = emb.at[0].set(0.0)                      # padding row zeroed (as in _load_char_embedding)
    params["char_embedding"] = emb

    params["conv_w"] = []                         # each (width, embed_dim, num)
    params["conv_b"] = []                         # each (1, num)
    for (w, num) in FILTERS:
        params["conv_w"].append(0.1 * jax.random.normal(next(it), (w, CHAR_EMBED_DIM, num), jnp.float32))
        params["conv_b"].append(0.1 * jax.random.normal(next(it), (1, num), jnp.float32))

    params["hw_w"] = []                           # each (F, 2F)  (x @ W layout)
    params["hw_b"] = []                           # each (1, 2F)
    # NOTE: torch.nn.Linear stores (2F, F) used as x @ W.T -> transpose when
    # loading real ELMo/AllenNLP weights.
    for _ in range(N_HIGHWAY):
        params["hw_w"].append(0.1 * jax.random.normal(next(it), (N_FILTERS, 2 * N_FILTERS), jnp.float32))
        params["hw_b"].append(0.1 * jax.random.normal(next(it), (1, 2 * N_FILTERS), jnp.float32))

    params["proj_w"] = 0.1 * jax.random.normal(next(it), (N_FILTERS, PROJECTION_DIM), jnp.float32)
    params["proj_b"] = 0.1 * jax.random.normal(next(it), (1, PROJECTION_DIM), jnp.float32)
    return params


# ----------------------------------------------------------------------------
# Pack params into kernel-ready form (done once, outside the hot path).
#  - The three filter banks (widths 1/2/3) are zero-padded to width 3 and laid
#    into ONE grouped weight W_big (128, 768):
#      W_big[16*j + d, 128*o + f] = W[j - o, d, f]   for 0 <= j - o < 3
#    so one MXU row (8 chars) yields 6 conv outputs at once.
#  - conv bias kept separate (added after max-over-time).
#  - projection zero-padded to 128 output lanes (lane-dense store).
# ----------------------------------------------------------------------------
def pack_params(params):
    W, D, F = MAX_FILTER_WIDTH, CHAR_EMBED_DIM, N_FILTERS

    conv_w = jnp.zeros((W, D, F), jnp.float32)
    conv_b = jnp.zeros((1, F), jnp.float32)
    off = 0
    for fi, (w, num) in enumerate(FILTERS):
        conv_w = conv_w.at[:w, :, off:off + num].set(params["conv_w"][fi])
        conv_b = conv_b.at[:, off:off + num].set(params["conv_b"][fi])
        off += num

    wbig = jnp.zeros((GROUP_K, GROUP_N), jnp.float32)
    for o in range(OUT_PER_GROUP):
        for k in range(W):
            j = o + k
            wbig = wbig.at[j * D:(j + 1) * D, o * F:(o + 1) * F].set(conv_w[k])

    proj_w = jnp.zeros((F, F), jnp.float32).at[:, :PROJECTION_DIM].set(params["proj_w"])
    proj_b = jnp.zeros((1, F), jnp.float32).at[:, :PROJECTION_DIM].set(params["proj_b"])

    return {
        "char_embedding": params["char_embedding"].astype(jnp.bfloat16),   # (262, 16)
        "conv_w_big": wbig.astype(jnp.bfloat16),                           # (128, 768)
        "conv_b": conv_b,                                                  # (1, 128) f32
        "time_mask": jnp.asarray(_TIME_MASK),                              # (9, 768) f32
        "hw_w": [w.astype(jnp.bfloat16) for w in params["hw_w"]],          # (128, 256) bf16
        "hw_b": [b for b in params["hw_b"]],                               # (1, 256) f32
        "proj_w": proj_w.astype(jnp.bfloat16),                             # (128, 128) bf16
        "proj_b": proj_b,                                                  # (1, 128) f32
    }


# ----------------------------------------------------------------------------
# Glue: sentence-boundary insertion (matches add_sentence_boundary_token_ids)
# ----------------------------------------------------------------------------
def add_sentence_boundary(char_ids, mask, bos_chars, eos_chars):
    B, S, C = char_ids.shape
    seq_len = mask.astype(jnp.int32).sum(axis=1)                 # (B,)
    out = jnp.zeros((B, S + 2, C), char_ids.dtype)
    out = out.at[:, 1:-1, :].set(char_ids)
    pos = jnp.arange(S + 2)
    bos_mask = (pos == 0)[None, :, None]
    eos_mask = (pos[None, :] == (seq_len + 1)[:, None])[:, :, None]
    out = jnp.where(bos_mask, bos_chars[None, None, :].astype(out.dtype), out)
    out = jnp.where(eos_mask, eos_chars[None, None, :].astype(out.dtype), out)
    new_mask = (out > 0).sum(axis=-1) > 0
    return out, new_mask


# ----------------------------------------------------------------------------
# Pallas kernel: grouped char-CNN + max-pool + ReLU + highway + projection
# ----------------------------------------------------------------------------
def _encoder_kernel(x_ref, wbig_ref, mask_ref, cbias_ref,
                    hw_w0_ref, hw_b0_ref, hw_w1_ref, hw_b1_ref,
                    proj_w_ref, proj_b_ref, out_ref):
    tn = x_ref.shape[1]

    # One big-M MXU matmul over all (token, time-group) rows: K=128, N=768.
    # tn is a multiple of 16 -> collapsing the leading dim is tile-aligned.
    x2 = x_ref[...].reshape(GROUPS * tn, GROUP_K)                      # (9*tn, 128) bf16
    conv = jnp.dot(x2, wbig_ref[...],
                   preferred_element_type=jnp.float32)                 # (9*tn, 768) f32

    # Max over time-groups; only groups with invalid tail positions get the
    # additive -1e30 mask (statically known -> just the last group here).
    def group_block(g):
        blk = conv[g * tn:(g + 1) * tn, :]
        if _MASK_NEEDED[g]:
            blk = blk + mask_ref[g:g + 1, :]
        return blk

    gmax = group_block(0)
    for g in range(1, GROUPS):
        gmax = jnp.maximum(gmax, group_block(g))                       # (tn, 768) f32

    # Max over the 6 in-row time offsets (static, 128-lane-aligned slices).
    tmax = gmax[:, 0:N_FILTERS]
    for o in range(1, OUT_PER_GROUP):
        tmax = jnp.maximum(tmax, gmax[:, o * N_FILTERS:(o + 1) * N_FILTERS])

    # Bias folded in AFTER the max (per-filter constant), then ReLU.
    token = jnp.maximum(tmax + cbias_ref[...], 0.0)                    # (tn, 128) f32

    # Highway layers: bf16 MXU matmuls, f32 gating math, cheap combine.
    for w_ref, b_ref in ((hw_w0_ref, hw_b0_ref), (hw_w1_ref, hw_b1_ref)):
        proj = jnp.dot(token.astype(jnp.bfloat16), w_ref[...],
                       preferred_element_type=jnp.float32) + b_ref[...]
        nonlinear = jnp.maximum(proj[:, :N_FILTERS], 0.0)
        gate = jax.nn.sigmoid(proj[:, N_FILTERS:])
        token = nonlinear + gate * (token - nonlinear)

    # Projection zero-padded to 128 lanes -> unmasked, lane-dense bf16 store.
    out_ref[...] = (jnp.dot(token.astype(jnp.bfloat16), proj_w_ref[...],
                            preferred_element_type=jnp.float32)
                    + proj_b_ref[...]).astype(out_ref.dtype)           # (tn, 128) bf16


def _choose_tile(n):
    """Remainder-aware tile: minimizes padding instead of rounding to 256."""
    n_tiles = max(1, _cdiv(n, TOKENS_PER_TILE))
    tn = _round_up(max(_cdiv(n, n_tiles), 16), 16)    # multiple of 16 (bf16 sublane tile)
    return tn, n_tiles


def _run_encoder_kernel(x_groups, packed, tn):
    n_pad = x_groups.shape[1]
    weights = (packed["conv_w_big"], packed["time_mask"], packed["conv_b"],
               packed["hw_w"][0], packed["hw_b"][0],
               packed["hw_w"][1], packed["hw_b"][1],
               packed["proj_w"], packed["proj_b"])

    def resident(w):                      # constant index_map -> stays in VMEM
        nd = w.ndim
        return pl.BlockSpec(w.shape, lambda i, _nd=nd: (0,) * _nd)

    return pl.pallas_call(
        _encoder_kernel,
        out_shape=jax.ShapeDtypeStruct((n_pad, N_FILTERS), jnp.bfloat16),
        grid=(n_pad // tn,),
        in_specs=[pl.BlockSpec((GROUPS, tn, GROUP_K), lambda i: (0, i, 0))]
                 + [resident(w) for w in weights],
        out_specs=pl.BlockSpec((tn, N_FILTERS), lambda i: (i, 0)),
        compiler_params=pltpu.CompilerParams(
            dimension_semantics=("parallel",),
            vmem_limit_bytes=48 * 1024 * 1024),
    )(x_groups, *weights)


# ----------------------------------------------------------------------------
# Full forward (mirrors ElmoCharacterEncoder.forward)
# ----------------------------------------------------------------------------
@jax.jit
def elmo_character_encoder_forward(inputs, packed):
    # inputs: int32 (batch, seq, max_chars)
    mask = (inputs > 0).sum(axis=-1) > 0
    ids_bos_eos, mask_bos_eos = add_sentence_boundary(inputs, mask, BOS_CHARS, EOS_CHARS)
    B, S2, C = ids_bos_eos.shape
    n = B * S2
    tn, n_tiles = _choose_tile(n)
    n_pad = tn * n_tiles

    # Dense partial-im2col at the char-id level: 8-char windows with stride 6,
    # group-major -> HBM array (9, n_pad, 128) bf16 has no lane/sublane padding
    # (~2.3 KB/token of kernel input DMA vs ~16 KB for the full padded im2col).
    ids = ids_bos_eos.reshape(n, C)
    ids = jnp.pad(ids, ((0, n_pad - n), (0, CHARS_PAD - C)))   # id 0 -> zero embedding row
    win_ids = jnp.stack(
        [ids[:, g * OUT_PER_GROUP:g * OUT_PER_GROUP + WIN_CHARS] for g in range(GROUPS)],
        axis=0)                                                          # (9, n_pad, 8)
    x_groups = jnp.take(packed["char_embedding"], win_ids, axis=0)      # (9, n_pad, 8, 16) bf16
    x_groups = x_groups.reshape(GROUPS, n_pad, GROUP_K)                 # (9, n_pad, 128) bf16
    # TODO(synk): fold this gather into the kernel (char-id blocks + resident
    # 262x16 table) once an efficient in-kernel row-gather is available; the
    # one-hot/MXU emulation costs more compute than the ~2 KB/token it saves.

    out = _run_encoder_kernel(x_groups, packed, tn)                     # (n_pad, 128) bf16
    token_embedding = out[:n, :PROJECTION_DIM].astype(jnp.float32)
    return {
        "mask": mask_bos_eos,
        "token_embedding": token_embedding.reshape(B, S2, PROJECTION_DIM),
    }


# ----------------------------------------------------------------------------
# Pure-JAX f32 reference (module semantics) for correctness checking
# ----------------------------------------------------------------------------
def reference_forward(inputs, params):
    mask = (inputs > 0).sum(axis=-1) > 0
    ids_bos_eos, mask_bos_eos = add_sentence_boundary(inputs, mask, BOS_CHARS, EOS_CHARS)
    B, S2, C = ids_bos_eos.shape
    emb = jnp.take(params["char_embedding"], ids_bos_eos.reshape(-1, C), axis=0)

    convs = []
    for fi, (width, num) in enumerate(FILTERS):
        Wf, bf = params["conv_w"][fi], params["conv_b"][fi]
        Lout = C - width + 1
        acc = jnp.zeros((emb.shape[0], Lout, num), jnp.float32)
        for k in range(width):
            acc = acc + jnp.einsum("nld,df->nlf", emb[:, k:k + Lout, :], Wf[k])
        acc = acc + bf.reshape(1, 1, num)
        convs.append(jnp.maximum(jnp.max(acc, axis=1), 0.0))
    token = jnp.concatenate(convs, axis=-1)
    for k in range(N_HIGHWAY):
        proj = token @ params["hw_w"][k] + params["hw_b"][k]
        nonlinear = jnp.maximum(proj[:, :N_FILTERS], 0.0)
        gate = jax.nn.sigmoid(proj[:, N_FILTERS:])
        token = gate * token + (1.0 - gate) * nonlinear
    token = token @ params["proj_w"] + params["proj_b"]
    return {"mask": mask_bos_eos, "token_embedding": token.reshape(B, S2, -1)}


# ----------------------------------------------------------------------------
if __name__ == "__main__":
    key = jax.random.PRNGKey(0)
    k_params, k_ids = jax.random.split(key)

    params = init_params(k_params)
    packed = pack_params(params)

    # Small deterministic inputs: batch=2, seq=8, max_chars=50 (char ids in [1,261]).
    batch, seq = 2, 8
    inputs = jax.random.randint(k_ids, (batch, seq, MAX_WORD_LENGTH), 1, CHAR_VOCAB, dtype=jnp.int32)
    # Make the last two words of the second sentence padding (all zeros).
    inputs = inputs.at[1, seq - 2:, :].set(0)

    out = elmo_character_encoder_forward(inputs, packed)
    jax.block_until_ready(out)

    ref = reference_forward(inputs, params)
    np.testing.assert_array_equal(np.asarray(out["mask"]), np.asarray(ref["mask"]))
    # bf16 MXU operands + bf16 output store vs f32 reference -> relaxed tolerance.
    np.testing.assert_allclose(np.asarray(out["token_embedding"]),
                               np.asarray(ref["token_embedding"]),
                               rtol=2e-2, atol=2e-2)

    assert out["token_embedding"].shape == (batch, seq + 2, PROJECTION_DIM)
    assert out["mask"].shape == (batch, seq + 2)
    print("KERNEL_OK")
</pallas_src>

<mosaic_0001>
module attributes {stable_mosaic.version = 11 : i64} {
  func.func @_encoder_kernel(%arg0: i32, %arg1: memref<9x32x128xbf16, #tpu.memory_space<vmem>>, %arg2: memref<128x768xbf16, #tpu.memory_space<vmem>>, %arg3: memref<9x768xf32, #tpu.memory_space<vmem>>, %arg4: memref<1x128xf32, #tpu.memory_space<vmem>>, %arg5: memref<128x256xbf16, #tpu.memory_space<vmem>>, %arg6: memref<1x256xf32, #tpu.memory_space<vmem>>, %arg7: memref<128x256xbf16, #tpu.memory_space<vmem>>, %arg8: memref<1x256xf32, #tpu.memory_space<vmem>>, %arg9: memref<128x128xbf16, #tpu.memory_space<vmem>>, %arg10: memref<1x128xf32, #tpu.memory_space<vmem>>, %arg11: memref<32x128xbf16, #tpu.memory_space<vmem>>) attributes {dimension_semantics = [#tpu.dimension_semantics<parallel>], iteration_bounds = array<i64: 1>, scalar_prefetch = 0 : i64, scratch_operands = 0 : i64, tpu.core_type = #tpu.core_type<tc>, window_params = [{transform_indices = @transform_0, window_bounds = array<i64: 9, 32, 128>}, {pipeline_mode = #tpu.pipeline_mode<synchronous>, transform_indices = @transform_1, window_bounds = array<i64: 128, 768>}, {pipeline_mode = #tpu.pipeline_mode<synchronous>, transform_indices = @transform_2, window_bounds = array<i64: 9, 768>}, {pipeline_mode = #tpu.pipeline_mode<synchronous>, transform_indices = @transform_3, window_bounds = array<i64: 1, 128>}, {pipeline_mode = #tpu.pipeline_mode<synchronous>, transform_indices = @transform_4, window_bounds = array<i64: 128, 256>}, {pipeline_mode = #tpu.pipeline_mode<synchronous>, transform_indices = @transform_5, window_bounds = array<i64: 1, 256>}, {pipeline_mode = #tpu.pipeline_mode<synchronous>, transform_indices = @transform_6, window_bounds = array<i64: 128, 256>}, {pipeline_mode = #tpu.pipeline_mode<synchronous>, transform_indices = @transform_7, window_bounds = array<i64: 1, 256>}, {pipeline_mode = #tpu.pipeline_mode<synchronous>, transform_indices = @transform_8, window_bounds = array<i64: 128, 128>}, {pipeline_mode = #tpu.pipeline_mode<synchronous>, transform_indices = @transform_9, window_bounds = array<i64: 1, 128>}, {transform_indices = @transform_10, window_bounds = array<i64: 32, 128>}]} {
    %c0 = arith.constant 0 : index
    %c0_0 = arith.constant 0 : index
    %c0_1 = arith.constant 0 : index
    %0 = vector.load %arg1[%c0, %c0_0, %c0_1] : memref<9x32x128xbf16, #tpu.memory_space<vmem>>, vector<9x32x128xbf16>
    %1 = vector.shape_cast %0 : vector<9x32x128xbf16> to vector<288x128xbf16>
    %c0_2 = arith.constant 0 : index
    %c0_3 = arith.constant 0 : index
    %2 = vector.load %arg2[%c0_2, %c0_3] : memref<128x768xbf16, #tpu.memory_space<vmem>>, vector<128x768xbf16>
    %cst = arith.constant dense<0.000000e+00> : vector<288x768xf32>
    %3 = tpu.matmul %1, %2, %cst {dimension_numbers = #tpu.dot_dimension_numbers<[1], [0], [0], [1], [0, 0, 1, 1], [], []>} : vector<288x128xbf16>, vector<128x768xbf16>, vector<288x768xf32> -> vector<288x768xf32>
    %4 = vector.extract_strided_slice %3 {offsets = [0, 0], sizes = [32, 768], strides = [1, 1]} : vector<288x768xf32> to vector<32x768xf32>
    %5 = vector.extract_strided_slice %3 {offsets = [32, 0], sizes = [32, 768], strides = [1, 1]} : vector<288x768xf32> to vector<32x768xf32>
    %6 = arith.maximumf %4, %5 : vector<32x768xf32>
    %7 = vector.extract_strided_slice %3 {offsets = [64, 0], sizes = [32, 768], strides = [1, 1]} : vector<288x768xf32> to vector<32x768xf32>
    %8 = arith.maximumf %6, %7 : vector<32x768xf32>
    %9 = vector.extract_strided_slice %3 {offsets = [96, 0], sizes = [32, 768], strides = [1, 1]} : vector<288x768xf32> to vector<32x768xf32>
    %10 = arith.maximumf %8, %9 : vector<32x768xf32>
    %11 = vector.extract_strided_slice %3 {offsets = [128, 0], sizes = [32, 768], strides = [1, 1]} : vector<288x768xf32> to vector<32x768xf32>
    %12 = arith.maximumf %10, %11 : vector<32x768xf32>
    %13 = vector.extract_strided_slice %3 {offsets = [160, 0], sizes = [32, 768], strides = [1, 1]} : vector<288x768xf32> to vector<32x768xf32>
    %14 = arith.maximumf %12, %13 : vector<32x768xf32>
    %15 = vector.extract_strided_slice %3 {offsets = [192, 0], sizes = [32, 768], strides = [1, 1]} : vector<288x768xf32> to vector<32x768xf32>
    %16 = arith.maximumf %14, %15 : vector<32x768xf32>
    %17 = vector.extract_strided_slice %3 {offsets = [224, 0], sizes = [32, 768], strides = [1, 1]} : vector<288x768xf32> to vector<32x768xf32>
    %18 = arith.maximumf %16, %17 : vector<32x768xf32>
    %19 = vector.extract_strided_slice %3 {offsets = [256, 0], sizes = [32, 768], strides = [1, 1]} : vector<288x768xf32> to vector<32x768xf32>
    %c8 = arith.constant 8 : index
    %c0_4 = arith.constant 0 : index
    %20 = vector.load %arg3[%c8, %c0_4] : memref<9x768xf32, #tpu.memory_space<vmem>>, vector<1x768xf32>
    %21 = vector.broadcast %20 : vector<1x768xf32> to vector<32x768xf32>
    %22 = arith.addf %19, %21 : vector<32x768xf32>
    %23 = arith.maximumf %18, %22 : vector<32x768xf32>
    %24 = vector.extract_strided_slice %23 {offsets = [0, 0], sizes = [32, 128], strides = [1, 1]} : vector<32x768xf32> to vector<32x128xf32>
    %25 = vector.extract_strided_slice %23 {offsets = [0, 128], sizes = [32, 128], strides = [1, 1]} : vector<32x768xf32> to vector<32x128xf32>
    %26 = arith.maximumf %24, %25 : vector<32x128xf32>
    %27 = vector.extract_strided_slice %23 {offsets = [0, 256], sizes = [32, 128], strides = [1, 1]} : vector<32x768xf32> to vector<32x128xf32>
    %28 = arith.maximumf %26, %27 : vector<32x128xf32>
    %29 = vector.extract_strided_slice %23 {offsets = [0, 384], sizes = [32, 128], strides = [1, 1]} : vector<32x768xf32> to vector<32x128xf32>
    %30 = arith.maximumf %28, %29 : vector<32x128xf32>
    %31 = vector.extract_strided_slice %23 {offsets = [0, 512], sizes = [32, 128], strides = [1, 1]} : vector<32x768xf32> to vector<32x128xf32>
    %32 = arith.maximumf %30, %31 : vector<32x128xf32>
    %33 = vector.extract_strided_slice %23 {offsets = [0, 640], sizes = [32, 128], strides = [1, 1]} : vector<32x768xf32> to vector<32x128xf32>
    %34 = arith.maximumf %32, %33 : vector<32x128xf32>
    %c0_5 = arith.constant 0 : index
    %c0_6 = arith.constant 0 : index
    %35 = vector.load %arg4[%c0_5, %c0_6] : memref<1x128xf32, #tpu.memory_space<vmem>>, vector<1x128xf32>
    %36 = vector.broadcast %35 : vector<1x128xf32> to vector<32x128xf32>
    %37 = arith.addf %34, %36 : vector<32x128xf32>
    %cst_7 = arith.constant 0.000000e+00 : f32
    %38 = vector.broadcast %cst_7 : f32 to vector<32x128xf32>
    %39 = arith.maximumf %37, %38 : vector<32x128xf32>
    %40 = arith.truncf %39 : vector<32x128xf32> to vector<32x128xbf16>
    %c0_8 = arith.constant 0 : index
    %c0_9 = arith.constant 0 : index
    %41 = vector.load %arg5[%c0_8, %c0_9] : memref<128x256xbf16, #tpu.memory_space<vmem>>, vector<128x256xbf16>
    %cst_10 = arith.constant dense<0.000000e+00> : vector<32x256xf32>
    %42 = tpu.matmul %40, %41, %cst_10 {dimension_numbers = #tpu.dot_dimension_numbers<[1], [0], [0], [1], [0, 0, 1, 1], [], []>} : vector<32x128xbf16>, vector<128x256xbf16>, vector<32x256xf32> -> vector<32x256xf32>
    %c0_11 = arith.constant 0 : index
    %c0_12 = arith.constant 0 : index
    %43 = vector.load %arg6[%c0_11, %c0_12] : memref<1x256xf32, #tpu.memory_space<vmem>>, vector<1x256xf32>
    %44 = vector.broadcast %43 : vector<1x256xf32> to vector<32x256xf32>
    %45 = arith.addf %42, %44 : vector<32x256xf32>
    %46 = vector.extract_strided_slice %45 {offsets = [0, 0], sizes = [32, 128], strides = [1, 1]} : vector<32x256xf32> to vector<32x128xf32>
    %cst_13 = arith.constant 0.000000e+00 : f32
    %47 = vector.broadcast %cst_13 : f32 to vector<32x128xf32>
    %48 = arith.maximumf %46, %47 : vector<32x128xf32>
    %49 = vector.extract_strided_slice %45 {offsets = [0, 128], sizes = [32, 128], strides = [1, 1]} : vector<32x256xf32> to vector<32x128xf32>
    %50 = arith.negf %49 : vector<32x128xf32>
    %51 = math.exp %50 : vector<32x128xf32>
    %cst_14 = arith.constant 1.000000e+00 : f32
    %52 = vector.broadcast %cst_14 : f32 to vector<32x128xf32>
    %53 = arith.addf %52, %51 : vector<32x128xf32>
    %54 = arith.divf %52, %53 : vector<32x128xf32>
    %55 = arith.subf %39, %48 : vector<32x128xf32>
    %56 = arith.mulf %54, %55 : vector<32x128xf32>
    %57 = arith.addf %48, %56 : vector<32x128xf32>
    %58 = arith.truncf %57 : vector<32x128xf32> to vector<32x128xbf16>
    %c0_15 = arith.constant 0 : index
    %c0_16 = arith.constant 0 : index
    %59 = vector.load %arg7[%c0_15, %c0_16] : memref<128x256xbf16, #tpu.memory_space<vmem>>, vector<128x256xbf16>
    %cst_17 = arith.constant dense<0.000000e+00> : vector<32x256xf32>
    %60 = tpu.matmul %58, %59, %cst_17 {dimension_numbers = #tpu.dot_dimension_numbers<[1], [0], [0], [1], [0, 0, 1, 1], [], []>} : vector<32x128xbf16>, vector<128x256xbf16>, vector<32x256xf32> -> vector<32x256xf32>
    %c0_18 = arith.constant 0 : index
    %c0_19 = arith.constant 0 : index
    %61 = vector.load %arg8[%c0_18, %c0_19] : memref<1x256xf32, #tpu.memory_space<vmem>>, vector<1x256xf32>
    %62 = vector.broadcast %61 : vector<1x256xf32> to vector<32x256xf32>
    %63 = arith.addf %60, %62 : vector<32x256xf32>
    %64 = vector.extract_strided_slice %63 {offsets = [0, 0], sizes = [32, 128], strides = [1, 1]} : vector<32x256xf32> to vector<32x128xf32>
    %cst_20 = arith.constant 0.000000e+00 : f32
    %65 = vector.broadcast %cst_20 : f32 to vector<32x128xf32>
    %66 = arith.maximumf %64, %65 : vector<32x128xf32>
    %67 = vector.extract_strided_slice %63 {offsets = [0, 128], sizes = [32, 128], strides = [1, 1]} : vector<32x256xf32> to vector<32x128xf32>
    %68 = arith.negf %67 : vector<32x128xf32>
    %69 = math.exp %68 : vector<32x128xf32>
    %cst_21 = arith.constant 1.000000e+00 : f32
    %70 = vector.broadcast %cst_21 : f32 to vector<32x128xf32>
    %71 = arith.addf %70, %69 : vector<32x128xf32>
    %72 = arith.divf %70, %71 : vector<32x128xf32>
    %73 = arith.subf %57, %66 : vector<32x128xf32>
    %74 = arith.mulf %72, %73 : vector<32x128xf32>
    %75 = arith.addf %66, %74 : vector<32x128xf32>
    %76 = arith.truncf %75 : vector<32x128xf32> to vector<32x128xbf16>
    %c0_22 = arith.constant 0 : index
    %c0_23 = arith.constant 0 : index
    %77 = vector.load %arg9[%c0_22, %c0_23] : memref<128x128xbf16, #tpu.memory_space<vmem>>, vector<128x128xbf16>
    %cst_24 = arith.constant dense<0.000000e+00> : vector<32x128xf32>
    %78 = tpu.matmul %76, %77, %cst_24 {dimension_numbers = #tpu.dot_dimension_numbers<[1], [0], [0], [1], [0, 0, 1, 1], [], []>} : vector<32x128xbf16>, vector<128x128xbf16>, vector<32x128xf32> -> vector<32x128xf32>
    %c0_25 = arith.constant 0 : index
    %c0_26 = arith.constant 0 : index
    %79 = vector.load %arg10[%c0_25, %c0_26] : memref<1x128xf32, #tpu.memory_space<vmem>>, vector<1x128xf32>
    %80 = vector.broadcast %79 : vector<1x128xf32> to vector<32x128xf32>
    %81 = arith.addf %78, %80 : vector<32x128xf32>
    %82 = arith.truncf %81 : vector<32x128xf32> to vector<32x128xbf16>
    %c0_27 = arith.constant 0 : index
    %c0_28 = arith.constant 0 : index
    %83 = vector.load %arg11[%c0_27, %c0_28] : memref<32x128xbf16, #tpu.memory_space<vmem>>, vector<32x128xbf16>
    tpu.vector_store %arg11[%c0_27, %c0_28], %82 {strides = array<i32>} : memref<32x128xbf16, #tpu.memory_space<vmem>>, vector<32x128xbf16>,
    return
  }
  func.func @transform_0(%arg0: i32) -> (i32, i32, i32) {
    %c0_i32 = arith.constant 0 : i32
    %c0_i32_0 = arith.constant 0 : i32
    %c0_i32_1 = arith.constant 0 : i32
    return %c0_i32, %arg0, %c0_i32_0 : i32, i32, i32
  }
  func.func @transform_1(%arg0: i32) -> (i32, i32) {
    %c0_i32 = arith.constant 0 : i32
    %c0_i32_0 = arith.constant 0 : i32
    %c0_i32_1 = arith.constant 0 : i32
    return %c0_i32, %c0_i32_0 : i32, i32
  }
  func.func @transform_2(%arg0: i32) -> (i32, i32) {
    %c0_i32 = arith.constant 0 : i32
    %c0_i32_0 = arith.constant 0 : i32
    %c0_i32_1 = arith.constant 0 : i32
    return %c0_i32, %c0_i32_0 : i32, i32
  }
  func.func @transform_3(%arg0: i32) -> (i32, i32) {
    %c0_i32 = arith.constant 0 : i32
    %c0_i32_0 = arith.constant 0 : i32
    %c0_i32_1 = arith.constant 0 : i32
    return %c0_i32, %c0_i32_0 : i32, i32
  }
  func.func @transform_4(%arg0: i32) -> (i32, i32) {
    %c0_i32 = arith.constant 0 : i32
    %c0_i32_0 = arith.constant 0 : i32
    %c0_i32_1 = arith.constant 0 : i32
    return %c0_i32, %c0_i32_0 : i32, i32
  }
  func.func @transform_5(%arg0: i32) -> (i32, i32) {
    %c0_i32 = arith.constant 0 : i32
    %c0_i32_0 = arith.constant 0 : i32
    %c0_i32_1 = arith.constant 0 : i32
    return %c0_i32, %c0_i32_0 : i32, i32
  }
  func.func @transform_6(%arg0: i32) -> (i32, i32) {
    %c0_i32 = arith.constant 0 : i32
    %c0_i32_0 = arith.constant 0 : i32
    %c0_i32_1 = arith.constant 0 : i32
    return %c0_i32, %c0_i32_0 : i32, i32
  }
  func.func @transform_7(%arg0: i32) -> (i32, i32) {
    %c0_i32 = arith.constant 0 : i32
    %c0_i32_0 = arith.constant 0 : i32
    %c0_i32_1 = arith.constant 0 : i32
    return %c0_i32, %c0_i32_0 : i32, i32
  }
  func.func @transform_8(%arg0: i32) -> (i32, i32) {
    %c0_i32 = arith.constant 0 : i32
    %c0_i32_0 = arith.constant 0 : i32
    %c0_i32_1 = arith.constant 0 : i32
    return %c0_i32, %c0_i32_0 : i32, i32
  }
  func.func @transform_9(%arg0: i32) -> (i32, i32) {
    %c0_i32 = arith.constant 0 : i32
    %c0_i32_0 = arith.constant 0 : i32
    %c0_i32_1 = arith.constant 0 : i32
    return %c0_i32, %c0_i32_0 : i32, i32
  }
  func.func @transform_10(%arg0: i32) -> (i32, i32) {
    %c0_i32 = arith.constant 0 : i32
    %c0_i32_0 = arith.constant 0 : i32
    return %arg0, %c0_i32 : i32, i32
  }
}

</mosaic_0001>

<bundles_post_ra>
// kernel: elmo_character_encoder_forward.1
= control target key start
LH: loop header
LB: loop body
LE: loop exit
PB: predicated region body
PF: predicated region fallthrough
CT: control target
= control target key end

     0   :  { %v2307_v1 = vmov 0   ;;  %s3205_s1 = inlined_call_operand.vmem [shape: bf16[128,768], index: 1, kind: input, shape index: {}]   ;;  %s3206_s0 = inlined_call_operand.vmem [shape: bf16[9,32,128], index: 0, kind: input, shape index: {}]   ;;  %s3207_s4 = inlined_call_operand.vmem [shape: bf16[128,256], index: 4, kind: input, shape index: {}]   ;;  %s3208_s2 = inlined_call_operand.vmem [shape: f32[9,768], index: 2, kind: input, shape index: {}]   ;;  %s3209_s3 = inlined_call_operand.vmem [shape: f32[1,128], index: 3, kind: input, shape index: {}]   ;;  %s3210_s6 = inlined_call_operand.vmem [shape: bf16[128,256], index: 6, kind: input, shape index: {}]   ;;  %s3211_s5 = inlined_call_operand.vmem [shape: f32[1,256], index: 5, kind: input, shape index: {}]   ;;  %s3212_s8 = inlined_call_operand.vmem [shape: bf16[128,128], index: 8, kind: input, shape index: {}]   ;;  %s3213_s7 = inlined_call_operand.vmem [shape: f32[1,256], index: 7, kind: input, shape index: {}]   ;;  %s3214_s9 = inlined_call_operand.vmem [shape: f32[1,128], index: 9, kind: input, shape index: {}]   ;;  %s3215_s10 = inlined_call_operand.vmem [shape: bf16[32,128], index: 10, kind: output, shape index: {}]  }
   0x1   :  { %v2129_v0 = vld [vmem:[%s3205_s1 + $0x4] ss:$24 sps:$4 sm:$0xff]   ;;  %500 = vmatprep.mubr.bf16.mxu0 %v2307_v1  ;;  %640 = vmatprep.mubr.bf16.mxu1 %v2307_v1  ;;  %v2131_v2 = vld [vmem:[%s3205_s1] ss:$24 sps:$4 sm:$0xff]   ;;  %v2132_v3 = vld [vmem:[%s3205_s1 + $0x34] ss:$24 sps:$4 sm:$0xff]  }
   0x2   :  { %468 = vmatprep.subr.bf16.mxu0 %v2129_v0  ;;  %2112 = vmatprep.subr.bf16.mxu1 %v2129_v0  ;;  %v2134_v4 = vld [vmem:[%s3205_s1 + $0x30] ss:$24 sps:$4 sm:$0xff]   ;;  %v2135_v5 = vld [vmem:[%s3205_s1 + $0x64] ss:$24 sps:$4 sm:$0xff]   ;;  %v2137_v6 = vld [vmem:[%s3205_s1 + $0x60] ss:$24 sps:$4 sm:$0xff]  }
   0x3   :  { %469 = vmatpush1.bf16.msra.mxu0 %v2131_v2  ;;  %2120 = vmatpush1.bf16.msra.mxu1 %v2131_v2  ;;  %v2138_v7 = vld [vmem:[%s3205_s1 + $0x94] ss:$24 sps:$4 sm:$0xff]   ;;  %v2140_v8 = vld [vmem:[%s3205_s1 + $0x90] ss:$24 sps:$4 sm:$0xff]   ;;  %v2141_v9 = vld [vmem:[%s3205_s1 + $0xc4] ss:$24 sps:$4 sm:$0xff]  }
   0x4   :  { %470 = vmatprep.subr.bf16.mxu0 %v2132_v3  ;;  %2113 = vmatprep.subr.bf16.mxu1 %v2132_v3  ;;  %v2143_v10 = vld [vmem:[%s3205_s1 + $0xc0] ss:$24 sps:$4 sm:$0xff]   ;;  %v2144_v11 = vld [vmem:[%s3205_s1 + $0xf4] ss:$24 sps:$4 sm:$0xff]   ;;  %v2146_v12 = vld [vmem:[%s3205_s1 + $0xf0] ss:$24 sps:$4 sm:$0xff]  }
   0x5   :  { %v2147_v13 = vld [vmem:[%s3205_s1 + $0x124] ss:$24 sps:$4 sm:$0xff]   ;;  %v2149_v14 = vld [vmem:[%s3205_s1 + $0x120] ss:$24 sps:$4 sm:$0xff]   ;;  %v2150_v15 = vld [vmem:[%s3205_s1 + $0x154] ss:$24 sps:$4 sm:$0xff]  }
   0x6   :  { %v2152_v16 = vld [vmem:[%s3205_s1 + $0x150] ss:$24 sps:$4 sm:$0xff]   ;;  %v2157_v17 = vld [vmem:[%s3205_s1 + $0xc] ss:$24 sps:$4 sm:$0xff]   ;;  %v2163_v23 = vld [vmem:[%s3205_s1 + $0x3c] ss:$24 sps:$4 sm:$0xff]  }
   0x7   :  { %471 = vmatpush1.bf16.msra.mxu0 %v2134_v4  ;;  %2121 = vmatpush1.bf16.msra.mxu1 %v2134_v4  ;;  %v2160_v18 = vld [vmem:[%s3205_s1 + $0x14] ss:$24 sps:$4 sm:$0xff]   ;;  %v2422_v19 = vld [vmem:[%s3206_s0] sm:$0xff]   ;;  %v2158_v22 = vld [vmem:[%s3205_s1 + $0x10] ss:$24 sps:$4 sm:$0xff]  }
   0x8   :  { %472 = vmatprep.subr.bf16.mxu0 %v2135_v5  ;;  %2114 = vmatprep.subr.bf16.mxu1 %v2135_v5  ;;  %v2427_v20 = vld [vmem:[%s3206_s0 + $0x70] sm:$0xff]   ;;  %v2155_v21 = vld [vmem:[%s3205_s1 + $0x8] ss:$24 sps:$4 sm:$0xff]   ;;  %v2174_v24 = vld [vmem:[%s3205_s1 + $0x44] ss:$24 sps:$4 sm:$0xff]  }
   0x9   :  { %v2161_v25 = vld [vmem:[%s3205_s1 + $0x38] ss:$24 sps:$4 sm:$0xff]   ;;  %v2168_v27 = vld [vmem:[%s3205_s1 + $0x6c] ss:$24 sps:$4 sm:$0xff]   ;;  %v2166_v31 = vld [vmem:[%s3205_s1 + $0x68] ss:$24 sps:$4 sm:$0xff]  }
   0xa   :  { %v2172_v26 = vld [vmem:[%s3205_s1 + $0x40] ss:$24 sps:$4 sm:$0xff]   ;;  %v2193_v28 = vld [vmem:[%s3205_s1 + $0x74] ss:$24 sps:$4 sm:$0xff]   ;;  %v2191_v33 = vld [vmem:[%s3205_s1 + $0x70] ss:$24 sps:$4 sm:$0xff]  }
   0xb   :  { %473 = vmatpush1.bf16.msra.mxu0 %v2137_v6  ;;  %2122 = vmatpush1.bf16.msra.mxu1 %v2137_v6  ;;  %v2460_v29 = vld [vmem:[%s3206_s0 + $0x8] sm:$0xff]   ;;  %v2465_v30 = vld [vmem:[%s3206_s0 + $0x78] sm:$0xff]   ;;  %v2492_v37 = vld [vmem:[%s3206_s0 + $0x10] sm:$0xff]  }
   0xc   :  { %474 = vmatprep.subr.bf16.mxu0 %v2138_v7  ;;  %2115 = vmatprep.subr.bf16.mxu1 %v2138_v7  ;;  %v2171_v32 = vld [vmem:[%s3205_s1 + $0x9c] ss:$24 sps:$4 sm:$0xff]   ;;  %v2169_v35 = vld [vmem:[%s3205_s1 + $0x98] ss:$24 sps:$4 sm:$0xff]   ;;  %v2179_v36 = vld [vmem:[%s3205_s1 + $0xcc] ss:$24 sps:$4 sm:$0xff]  }
   0xd   :  { %v2198_v34 = vld [vmem:[%s3205_s1 + $0xa4] ss:$24 sps:$4 sm:$0xff]   ;;  %v2196_v38 = vld [vmem:[%s3205_s1 + $0xa0] ss:$24 sps:$4 sm:$0xff]   ;;  %v2203_v42 = vld [vmem:[%s3205_s1 + $0xd4] ss:$24 sps:$4 sm:$0xff]  }
   0xe   :  { %v2500_v39 = vld [vmem:[%s3206_s0 + $0x80] sm:$0xff]   ;;  %v2182_v41 = vld [vmem:[%s3205_s1 + $0xfc] ss:$24 sps:$4 sm:$0xff]   ;;  %v2201_v43 = vld [vmem:[%s3205_s1 + $0xd0] ss:$24 sps:$4 sm:$0xff]  }
   0xf   :  { %475 = vmatpush1.bf16.msra.mxu0 %v2140_v8  ;;  %2123 = vmatpush1.bf16.msra.mxu1 %v2140_v8  ;;  %v2177_v40 = vld [vmem:[%s3205_s1 + $0xc8] ss:$24 sps:$4 sm:$0xff]   ;;  %v2180_v44 = vld [vmem:[%s3205_s1 + $0xf8] ss:$24 sps:$4 sm:$0xff]   ;;  %v2207_v45 = vld [vmem:[%s3205_s1 + $0x104] ss:$24 sps:$4 sm:$0xff]  }
  0x10   :  { %476 = vmatprep.subr.bf16.mxu0 %v2141_v9  ;;  %2116 = vmatprep.subr.bf16.mxu1 %v2141_v9  ;;  %v2187_v46 = vld [vmem:[%s3205_s1 + $0x12c] ss:$24 sps:$4 sm:$0xff]   ;;  %v2530_v47 = vld [vmem:[%s3206_s0 + $0x18] sm:$0xff]   ;;  %v2185_v49 = vld [vmem:[%s3205_s1 + $0x128] ss:$24 sps:$4 sm:$0xff]  }
  0x11   :  { %v2535_v48 = vld [vmem:[%s3206_s0 + $0x88] sm:$0xff]   ;;  %v2190_v50 = vld [vmem:[%s3205_s1 + $0x15c] ss:$24 sps:$4 sm:$0xff]   ;;  %v2205_v51 = vld [vmem:[%s3205_s1 + $0x100] ss:$24 sps:$4 sm:$0xff]  }
  0x12   :  { %v2212_v52 = vld [vmem:[%s3205_s1 + $0x134] ss:$24 sps:$4 sm:$0xff]   ;;  %v2188_v53 = vld [vmem:[%s3205_s1 + $0x158] ss:$24 sps:$4 sm:$0xff]   ;;  %v2562_v55 = vld [vmem:[%s3206_s0 + $0x20] sm:$0xff]  }
  0x13   :  { %477 = vmatpush1.bf16.msra.mxu0 %v2143_v10  ;;  %2124 = vmatpush1.bf16.msra.mxu1 %v2143_v10  ;;  %v2210_v54 = vld [vmem:[%s3205_s1 + $0x130] ss:$24 sps:$4 sm:$0xff]   ;;  %v2217_v56 = vld [vmem:[%s3205_s1 + $0x164] ss:$24 sps:$4 sm:$0xff]   ;;  %v2215_v57 = vld [vmem:[%s3205_s1 + $0x160] ss:$24 sps:$4 sm:$0xff]  }
  0x14   :  { %478 = vmatprep.subr.bf16.mxu0 %v2144_v11  ;;  %2117 = vmatprep.subr.bf16.mxu1 %v2144_v11  ;;  %v2577_v58 = vld [vmem:[%s3206_s0 + $0x28] sm:$0xff]   ;;  %v2586_v59 = vld [vmem:[%s3206_s0 + $0x30] sm:$0xff]   ;;  %v2595_v60 = vld [vmem:[%s3206_s0 + $0x38] sm:$0xff]  }
  0x15   :  { %v2204_v61 = vld [vmem:[%s3206_s0 + $0x40] sm:$0xff]   ;;  %v2208_v62 = vld [vmem:[%s3206_s0 + $0x48] sm:$0xff]   ;;  %v2209_v63 = vld [vmem:[%s3206_s0 + $0x50] sm:$0xff]  }
  0x16   :  { %v2213_v0 = vld [vmem:[%s3206_s0 + $0x58] sm:$0xff]   ;;  %v2214_v2 = vld [vmem:[%s3206_s0 + $0x60] sm:$0xff]   ;;  %v2218_v3 = vld [vmem:[%s3206_s0 + $0x68] sm:$0xff]  }
  0x17   :  { %479 = vmatpush1.bf16.msra.mxu0 %v2146_v12  ;;  %2125 = vmatpush1.bf16.msra.mxu1 %v2146_v12  ;;  %v2219_v4 = vld [vmem:[%s3207_s4] ss:$8 sps:$4 sm:$0xff]   ;;  %v2221_v5 = vld [vmem:[%s3207_s4 + $0x4] ss:$8 sps:$4 sm:$0xff]  }
  0x18   :  { %480 = vmatprep.subr.bf16.mxu0 %v2147_v13  ;;  %2118 = vmatprep.subr.bf16.mxu1 %v2147_v13 }
  0x1b   :  { %481 = vmatpush1.bf16.msra.mxu0 %v2149_v14  ;;  %2126 = vmatpush1.bf16.msra.mxu1 %v2149_v14  ;;  %v2222_v14 = vld [vmem:[%s3207_s4 + $0x10] ss:$8 sps:$4 sm:$0xff]  }
  0x1c   :  { %482 = vmatprep.subr.bf16.mxu0 %v2150_v15  ;;  %2119 = vmatprep.subr.bf16.mxu1 %v2150_v15  ;;  %v2224_v15 = vld [vmem:[%s3207_s4 + $0x14] ss:$8 sps:$4 sm:$0xff]  }
  0x1f   :  { %483 = vmatpush1.bf16.msra.mxu0 %v2152_v16  ;;  %2127 = vmatpush1.bf16.msra.mxu1 %v2152_v16 }
  0x20   :  { %681 = vmatprep.subr.bf16.mxu1 %v2157_v17  ;;  %894 = vmatprep.subr.bf16.mxu0 %v2160_v18 }
  0x22   :  { %501 = vmatmul.mubr.bf16.vlgmr.msra.gmra.mrb[0].mxu0 %v2422_v19  ;;  %641 = vmatmul.mubr.bf16.vlgmr.msra.gmra.mrb[0].mxu1 %v2427_v20 }
  0x23   :  { %682 = vmatpush1.bf16.msra.mxu1 %v2155_v21  ;;  %895 = vmatpush1.bf16.msra.mxu0 %v2158_v22 }
  0x24   :  { %683 = vmatprep.subr.bf16.mxu1 %v2163_v23  ;;  %510 = vmatprep.mubr.bf16.mxu0 %v2307_v1 }
  0x25   :  { %650 = vmatprep.mubr.bf16.mxu1 %v2307_v1  ;;  %896 = vmatprep.subr.bf16.mxu0 %v2174_v24 }
  0x27   :  { %684 = vmatpush1.bf16.msra.mxu1 %v2161_v25  ;;  %897 = vmatpush1.bf16.msra.mxu0 %v2172_v26 }
  0x28   :  { %685 = vmatprep.subr.bf16.mxu1 %v2168_v27  ;;  %898 = vmatprep.subr.bf16.mxu0 %v2193_v28 }
  0x2a   :  { %511 = vmatmul.mubr.bf16.gmra.mrb[4].mxu0 %v2460_v29  ;;  %651 = vmatmul.mubr.bf16.gmra.mrb[4].mxu1 %v2465_v30 }
  0x2b   :  { %686 = vmatpush1.bf16.msra.mxu1 %v2166_v31  ;;  %520 = vmatprep.mubr.bf16.mxu0 %v2307_v1 }
  0x2c   :  { %687 = vmatprep.subr.bf16.mxu1 %v2171_v32  ;;  %660 = vmatprep.mubr.bf16.mxu1 %v2307_v1 }
  0x2d   :  { %899 = vmatpush1.bf16.msra.mxu0 %v2191_v33 }
  0x2e   :  { %900 = vmatprep.subr.bf16.mxu0 %v2198_v34 }
  0x2f   :  { %688 = vmatpush1.bf16.msra.mxu1 %v2169_v35 }
  0x30   :  { %689 = vmatprep.subr.bf16.mxu1 %v2179_v36 }
  0x31   :  { %901 = vmatpush1.bf16.msra.mxu0 %v2196_v38  ;;  %v2227_v38 = vld [vmem:[%s3207_s4 + $0x24] ss:$8 sps:$4 sm:$0xff]  }
  0x32   :  { %521 = vmatmul.mubr.bf16.gmra.mrb[8].mxu0 %v2492_v37  ;;  %661 = vmatmul.mubr.bf16.gmra.mrb[8].mxu1 %v2500_v39 }
  0x33   :  { %690 = vmatpush1.bf16.msra.mxu1 %v2177_v40  ;;  %530 = vmatprep.mubr.bf16.mxu0 %v2307_v1 }
  0x34   :  { %691 = vmatprep.subr.bf16.mxu1 %v2182_v41  ;;  %670 = vmatprep.mubr.bf16.mxu1 %v2307_v1 }
  0x35   :  { %902 = vmatprep.subr.bf16.mxu0 %v2203_v42 }
  0x36   :  { %903 = vmatpush1.bf16.msra.mxu0 %v2201_v43 }
  0x37   :  { %692 = vmatpush1.bf16.msra.mxu1 %v2180_v44  ;;  %904 = vmatprep.subr.bf16.mxu0 %v2207_v45 }
  0x38   :  { %693 = vmatprep.subr.bf16.mxu1 %v2187_v46 }
  0x3a   :  { %531 = vmatmul.mubr.bf16.gmra.mrb[12].mxu0 %v2530_v47  ;;  %671 = vmatmul.mubr.bf16.gmra.mrb[12].mxu1 %v2535_v48 }
  0x3b   :  { %694 = vmatpush1.bf16.msra.mxu1 %v2185_v49  ;;  %540 = vmatprep.mubr.bf16.mxu0 %v2307_v1 }
  0x3c   :  { %695 = vmatprep.subr.bf16.mxu1 %v2190_v50  ;;  %713 = vmatprep.mubr.bf16.mxu1 %v2307_v1 }
  0x3d   :  { %905 = vmatpush1.bf16.msra.mxu0 %v2205_v51 }
  0x3e   :  { %906 = vmatprep.subr.bf16.mxu0 %v2212_v52 }
  0x3f   :  { %696 = vmatpush1.bf16.msra.mxu1 %v2188_v53 }
  0x40   :  { %1503 = vmatprep.subr.bf16.mxu1 %v2221_v5  ;;  %v2228_v5 = vld [vmem:[%s3207_s4 + $0x30] ss:$8 sps:$4 sm:$0xff]  }
  0x41   :  { %907 = vmatpush1.bf16.msra.mxu0 %v2210_v54 }
  0x42   :  { %541 = vmatmul.mubr.bf16.gmra.mrb[16].mxu0 %v2562_v55  ;;  %714 = vmatmul.mubr.bf16.vlgmr.msra.gmra.mrb[16].mxu1 %v2422_v19 }
  0x43   :  { %550 = vmatprep.mubr.bf16.mxu0 %v2307_v1  ;;  %723 = vmatprep.mubr.bf16.mxu1 %v2307_v1 }
  0x44   :  { %908 = vmatprep.subr.bf16.mxu0 %v2217_v56  ;;  %1504 = vmatpush1.bf16.msra.mxu1 %v2219_v4 }
  0x45   :  { %909 = vmatpush1.bf16.msra.mxu0 %v2215_v57  ;;  %1505 = vmatprep.subr.bf16.mxu1 %v2224_v15 }
  0x48   :  { %1506 = vmatpush1.bf16.msra.mxu1 %v2222_v14 }
  0x49   :  { %1507 = vmatprep.subr.bf16.mxu1 %v2227_v38 }
  0x4a   :  { %551 = vmatmul.mubr.bf16.gmra.mrb[20].mxu0 %v2577_v58  ;;  %724 = vmatmul.mubr.bf16.gmra.mrb[20].mxu1 %v2460_v29 }
  0x4b   :  { %560 = vmatprep.mubr.bf16.mxu0 %v2307_v1  ;;  %733 = vmatprep.mubr.bf16.mxu1 %v2307_v1 }
  0x52   :  { %561 = vmatmul.mubr.bf16.gmra.mrb[24].mxu0 %v2586_v59  ;;  %734 = vmatmul.mubr.bf16.gmra.mrb[24].mxu1 %v2492_v37 }
  0x53   :  { %570 = vmatprep.mubr.bf16.mxu0 %v2307_v1  ;;  %743 = vmatprep.mubr.bf16.mxu1 %v2307_v1 }
  0x5a   :  { %571 = vmatmul.mubr.bf16.gmra.mrb[28].mxu0 %v2595_v60  ;;  %744 = vmatmul.mubr.bf16.gmra.mrb[28].mxu1 %v2530_v47 }
  0x5b   :  { %580 = vmatprep.mubr.bf16.mxu0 %v2307_v1  ;;  %753 = vmatprep.mubr.bf16.mxu1 %v2307_v1 }
  0x62   :  { %581 = vmatmul.mubr.bf16.gmra.mrb[32].mxu0 %v2204_v61  ;;  %754 = vmatmul.mubr.bf16.gmra.mrb[32].mxu1 %v2562_v55 }
  0x63   :  { %590 = vmatprep.mubr.bf16.mxu0 %v2307_v1  ;;  %763 = vmatprep.mubr.bf16.mxu1 %v2307_v1 }
  0x6a   :  { %591 = vmatmul.mubr.bf16.gmra.mrb[36].mxu0 %v2208_v62  ;;  %764 = vmatmul.mubr.bf16.gmra.mrb[36].mxu1 %v2577_v58 }
  0x6b   :  { %600 = vmatprep.mubr.bf16.mxu0 %v2307_v1  ;;  %773 = vmatprep.mubr.bf16.mxu1 %v2307_v1 }
  0x72   :  { %601 = vmatmul.mubr.bf16.gmra.mrb[40].mxu0 %v2209_v63  ;;  %774 = vmatmul.mubr.bf16.gmra.mrb[40].mxu1 %v2586_v59 }
  0x73   :  { %610 = vmatprep.mubr.bf16.mxu0 %v2307_v1  ;;  %783 = vmatprep.mubr.bf16.mxu1 %v2307_v1 }
  0x7a   :  { %611 = vmatmul.mubr.bf16.gmra.mrb[44].mxu0 %v2213_v0  ;;  %784 = vmatmul.mubr.bf16.gmra.mrb[44].mxu1 %v2595_v60 }
  0x7b   :  { %620 = vmatprep.mubr.bf16.mxu0 %v2307_v1  ;;  %793 = vmatprep.mubr.bf16.mxu1 %v2307_v1 }
  0x82   :  { %621 = vmatmul.mubr.bf16.gmra.mrb[48].mxu0 %v2214_v2  ;;  %794 = vmatmul.mubr.bf16.gmra.mrb[48].mxu1 %v2204_v61 }
  0x83   :  { %630 = vmatprep.mubr.bf16.mxu0 %v2307_v1  ;;  %803 = vmatprep.mubr.bf16.mxu1 %v2307_v1 }
  0x8a   :  { %631 = vmatmul.mubr.bf16.gmra.mrb[52].mxu0 %v2218_v3  ;;  %804 = vmatmul.mubr.bf16.gmra.mrb[52].mxu1 %v2208_v62 }
  0x8b   :  { %813 = vmatprep.mubr.bf16.mxu1 %v2307_v1  ;;  %926 = vmatprep.mubr.bf16.mxu0 %v2307_v1 }
  0x92   :  { %814 = vmatmul.mubr.bf16.gmra.mrb[56].mxu1 %v2209_v63  ;;  %927 = vmatmul.mubr.bf16.vlgmr.msra.gmra.mrb[56].mxu0 %v2422_v19 }
  0x93   :  { %823 = vmatprep.mubr.bf16.mxu1 %v2307_v1  ;;  %936 = vmatprep.mubr.bf16.mxu0 %v2307_v1 }
  0x9a   :  { %824 = vmatmul.mubr.bf16.gmra.mrb[60].mxu1 %v2213_v0  ;;  %937 = vmatmul.mubr.bf16.gmra.mrb[60].mxu0 %v2460_v29 }
  0x9b   :  { %833 = vmatprep.mubr.bf16.mxu1 %v2307_v1  ;;  %946 = vmatprep.mubr.bf16.mxu0 %v2307_v1 }
  0xa2   :  { %834 = vmatmul.mubr.bf16.gmra.mrb[64].mxu1 %v2214_v2  ;;  %947 = vmatmul.mubr.bf16.gmra.mrb[64].mxu0 %v2492_v37 }
  0xa3   :  { %843 = vmatprep.mubr.bf16.mxu1 %v2307_v1  ;;  %956 = vmatprep.mubr.bf16.mxu0 %v2307_v1 }
  0xaa   :  { %844 = vmatmul.mubr.bf16.gmra.mrb[68].mxu1 %v2218_v3  ;;  %957 = vmatmul.mubr.bf16.gmra.mrb[68].mxu0 %v2530_v47 }
  0xab   :  { %853 = vmatprep.mubr.bf16.mxu1 %v2307_v1  ;;  %966 = vmatprep.mubr.bf16.mxu0 %v2307_v1 }
  0xb2   :  { %854 = vmatmul.mubr.bf16.gmra.mrb[72].mxu1 %v2427_v20  ;;  %967 = vmatmul.mubr.bf16.gmra.mrb[72].mxu0 %v2562_v55 }
  0xb3   :  { %863 = vmatprep.mubr.bf16.mxu1 %v2307_v1  ;;  %976 = vmatprep.mubr.bf16.mxu0 %v2307_v1 }
  0xba   :  { %864 = vmatmul.mubr.bf16.gmra.mrb[76].mxu1 %v2465_v30  ;;  %977 = vmatmul.mubr.bf16.gmra.mrb[76].mxu0 %v2577_v58 }
  0xbb   :  { %873 = vmatprep.mubr.bf16.mxu1 %v2307_v1  ;;  %986 = vmatprep.mubr.bf16.mxu0 %v2307_v1 }
  0xc2   :  { %874 = vmatmul.mubr.bf16.gmra.mrb[80].mxu1 %v2500_v39  ;;  %987 = vmatmul.mubr.bf16.gmra.mrb[80].mxu0 %v2586_v59 }
  0xc3   :  { %883 = vmatprep.mubr.bf16.mxu1 %v2307_v1  ;;  %996 = vmatprep.mubr.bf16.mxu0 %v2307_v1 }
  0xca   :  { %884 = vmatmul.mubr.bf16.gmra.mrb[84].mxu1 %v2535_v48  ;;  %997 = vmatmul.mubr.bf16.gmra.mrb[84].mxu0 %v2595_v60 }
  0xcb   :  { %1006 = vmatprep.mubr.bf16.mxu0 %v2307_v1  ;;  %1535 = vmatprep.mubr.bf16.mxu1 %v2307_v1 }
  0xd2   :  { %1007 = vmatmul.mubr.bf16.gmra.mrb[88].mxu0 %v2204_v61 }
  0xd3   :  { %1016 = vmatprep.mubr.bf16.mxu0 %v2307_v1 }
  0xda   :  { %1017 = vmatmul.mubr.bf16.gmra.mrb[92].mxu0 %v2208_v62 }
  0xdb   :  { %1026 = vmatprep.mubr.bf16.mxu0 %v2307_v1 }
  0xe2   :  { %1027 = vmatmul.mubr.bf16.gmra.mrb[96].mxu0 %v2209_v63 }
  0xe3   :  { %1036 = vmatprep.mubr.bf16.mxu0 %v2307_v1 }
  0xea   :  { %1037 = vmatmul.mubr.bf16.gmra.mrb[100].mxu0 %v2213_v0 }
  0xeb   :  { %1046 = vmatprep.mubr.bf16.mxu0 %v2307_v1 }
  0xf2   :  { %1047 = vmatmul.mubr.bf16.gmra.mrb[104].mxu0 %v2214_v2 }
  0xf3   :  { %1056 = vmatprep.mubr.bf16.mxu0 %v2307_v1 }
  0xf5   :  { %v502_v6 = vpop.f32.mrb[0].mxu0  ;;  %v2674_v7 = vpop.f32.mrb[0].mxu1 }
  0xf6   :  { %v504_v8 = vpop.f32.mrb[1].mxu0  ;;  %v2676_v9 = vpop.f32.mrb[1].mxu1 }
  0xf7   :  { %v506_v10 = vpop.f32.mrb[2].mxu0  ;;  %v2678_v11 = vpop.f32.mrb[2].mxu1 }
  0xf8   :  { %v508_v12 = vpop.f32.mrb[3].mxu0  ;;  %v2680_v13 = vpop.f32.mrb[3].mxu1 }
  0xfa   :  { %1057 = vmatmul.mubr.bf16.gmra.mrb[108].mxu0 %v2218_v3 }
  0xfb   :  { %1066 = vmatprep.mubr.bf16.mxu0 %v2307_v1 }
  0xfd   :  { %v512_v16 = vpop.f32.mrb[4].mxu0  ;;  %v2689_v17 = vpop.f32.mrb[4].mxu1 }
  0xfe   :  { %v514_v18 = vpop.f32.mrb[5].mxu0  ;;  %v2691_v19 = vpop.f32.mrb[5].mxu1 }
  0xff   :  { %v516_v21 = vpop.f32.mrb[6].mxu0  ;;  %v2693_v22 = vpop.f32.mrb[6].mxu1 }
 0x100   :  { %v2695_v23 = vpop.f32.mrb[7].mxu0  ;;  %v2697_v24 = vpop.f32.mrb[7].mxu1 }
 0x102   :  { %1067 = vmatmul.mubr.bf16.gmra.mrb[112].mxu0 %v2427_v20  ;;  %v2225_v20 = vld [vmem:[%s3207_s4 + $0x20] ss:$8 sps:$4 sm:$0xff]  }
 0x103   :  { %1076 = vmatprep.mubr.bf16.mxu0 %v2307_v1  ;;  %1508 = vmatpush1.bf16.msra.mxu1 %v2225_v20 }
 0x105   :  { %v522_v25 = vpop.f32.mrb[8].mxu0  ;;  %v2701_v26 = vpop.f32.mrb[8].mxu1 }
 0x106   :  { %v1107_v27 = vmax.f32 %v502_v6, %v522_v25  ;;  %v524_v28 = vpop.f32.mrb[9].mxu0  ;;  %v2703_v29 = vpop.f32.mrb[9].mxu1  ;;  %v2230_v6 = vld [vmem:[%s3207_s4 + $0x34] ss:$8 sps:$4 sm:$0xff]  }
 0x107   :  { %v1108_v31 = vmax.f32 %v504_v8, %v524_v28  ;;  %v526_v32 = vpop.f32.mrb[10].mxu0  ;;  %v2705_v33 = vpop.f32.mrb[10].mxu1  ;;  %1509 = vmatprep.subr.bf16.mxu1 %v2230_v6 }
 0x108   :  { %v1113_v34 = vmax.f32 %v506_v10, %v526_v32  ;;  %v528_v35 = vpop.f32.mrb[11].mxu0  ;;  %v2707_v36 = vpop.f32.mrb[11].mxu1  ;;  %1510 = vmatpush1.bf16.msra.mxu1 %v2228_v5 }
 0x109   :  { %v1114_v37 = vmax.f32 %v508_v12, %v528_v35 }
 0x10a   :  { %1077 = vmatmul.mubr.bf16.gmra.mrb[116].mxu0 %v2465_v30 }
 0x10b   :  { %1086 = vmatprep.mubr.bf16.mxu0 %v2307_v1 }
 0x10d   :  { %v532_v40 = vpop.f32.mrb[12].mxu0  ;;  %v2717_v41 = vpop.f32.mrb[12].mxu1 }
 0x10e   :  { %v1119_v42 = vmax.f32 %v512_v16, %v532_v40  ;;  %v534_v43 = vpop.f32.mrb[13].mxu0  ;;  %v2719_v44 = vpop.f32.mrb[13].mxu1 }
 0x10f   :  { %v1120_v45 = vmax.f32 %v514_v18, %v534_v43  ;;  %v536_v46 = vpop.f32.mrb[14].mxu0  ;;  %v2721_v47 = vpop.f32.mrb[14].mxu1 }
 0x110   :  { %v1125_v49 = vmax.f32 %v516_v21, %v536_v46  ;;  %v538_v50 = vpop.f32.mrb[15].mxu0  ;;  %v2723_v51 = vpop.f32.mrb[15].mxu1 }
 0x111   :  { %v1126_v30 = vmax.f32 %v2695_v23, %v538_v50 }
 0x112   :  { %1087 = vmatmul.mubr.bf16.gmra.mrb[120].mxu0 %v2500_v39 }
 0x113   :  { %1096 = vmatprep.mubr.bf16.mxu0 %v2307_v1 }
 0x115   :  { %v542_v52 = vpop.f32.mrb[16].mxu0  ;;  %v2728_v53 = vpop.f32.mrb[16].mxu1 }
 0x116   :  { %v2730_v54 = vmax.f32 %v1107_v27, %v542_v52  ;;  %v544_v55 = vpop.f32.mrb[17].mxu0  ;;  %v2732_v56 = vpop.f32.mrb[17].mxu1 }
 0x117   :  { %v2734_v57 = vmax.f32 %v1108_v31, %v544_v55  ;;  %v546_v58 = vpop.f32.mrb[18].mxu0  ;;  %v2736_v59 = vpop.f32.mrb[18].mxu1 }
 0x118   :  { %v2738_v60 = vmax.f32 %v1113_v34, %v546_v58  ;;  %v548_v61 = vpop.f32.mrb[19].mxu0  ;;  %v2740_v62 = vpop.f32.mrb[19].mxu1  ;;  %v2233_v58 = vld [vmem:[%s3207_s4 + $0x44] ss:$8 sps:$4 sm:$0xff]  }
 0x119   :  { %v2742_v39 = vmax.f32 %v1114_v37, %v548_v61  ;;  %1511 = vmatprep.subr.bf16.mxu1 %v2233_v58 }
 0x11a   :  { %1097 = vmatmul.mubr.bf16.gmra.mrb[124].mxu0 %v2535_v48 }
 0x11d   :  { %v552_v63 = vpop.f32.mrb[20].mxu0  ;;  %v2745_v0 = vpop.f32.mrb[20].mxu1 }
 0x11e   :  { %v2747_v2 = vmax.f32 %v1119_v42, %v552_v63  ;;  %v554_v3 = vpop.f32.mrb[21].mxu0  ;;  %v2749_v4 = vpop.f32.mrb[21].mxu1 }
 0x11f   :  { %v2757_v8 = vmax.f32 %v1120_v45, %v554_v3  ;;  %v556_v10 = vpop.f32.mrb[22].mxu0  ;;  %v2759_v48 = vpop.f32.mrb[22].mxu1 }
 0x120   :  { %v2761_v12 = vmax.f32 %v1125_v49, %v556_v10  ;;  %v558_v14 = vpop.f32.mrb[23].mxu0  ;;  %v2763_v15 = vpop.f32.mrb[23].mxu1 }
 0x121   :  { %v2765_v16 = vmax.f32 %v1126_v30, %v558_v14 }
 0x125   :  { %v562_v18 = vpop.f32.mrb[24].mxu0  ;;  %v735_v21 = vpop.f32.mrb[24].mxu1 }
 0x126   :  { %v1155_v23 = vmax.f32 %v2730_v54, %v562_v18  ;;  %v564_v25 = vpop.f32.mrb[25].mxu0  ;;  %v1109_v27 = vmax.f32 %v2728_v53, %v735_v21  ;;  %v737_v28 = vpop.f32.mrb[25].mxu1 }
 0x127   :  { %v1156_v31 = vmax.f32 %v2734_v57, %v564_v25  ;;  %v566_v32 = vpop.f32.mrb[26].mxu0  ;;  %v1110_v34 = vmax.f32 %v2732_v56, %v737_v28  ;;  %v739_v35 = vpop.f32.mrb[26].mxu1  ;;  %v2231_v57 = vld [vmem:[%s3207_s4 + $0x40] ss:$8 sps:$4 sm:$0xff]  }
 0x128   :  { %v1161_v37 = vmax.f32 %v2738_v60, %v566_v32  ;;  %v568_v20 = vpop.f32.mrb[27].mxu0  ;;  %v1115_v38 = vmax.f32 %v2736_v59, %v739_v35  ;;  %v741_v40 = vpop.f32.mrb[27].mxu1  ;;  %1512 = vmatpush1.bf16.msra.mxu1 %v2231_v57 }
 0x129   :  { %v1162_v42 = vmax.f32 %v2742_v39, %v568_v20  ;;  %v1116_v43 = vmax.f32 %v2740_v62, %v741_v40 }
 0x12d   :  { %v572_v45 = vpop.f32.mrb[28].mxu0  ;;  %v745_v46 = vpop.f32.mrb[28].mxu1 }
 0x12e   :  { %v1167_v49 = vmax.f32 %v2747_v2, %v572_v45  ;;  %v574_v50 = vpop.f32.mrb[29].mxu0  ;;  %v1121_v30 = vmax.f32 %v2745_v0, %v745_v46  ;;  %v747_v52 = vpop.f32.mrb[29].mxu1 }
 0x12f   :  { %v1168_v53 = vmax.f32 %v2757_v8, %v574_v50  ;;  %v576_v54 = vpop.f32.mrb[30].mxu0  ;;  %v1122_v55 = vmax.f32 %v2749_v4, %v747_v52  ;;  %v749_v56 = vpop.f32.mrb[30].mxu1  ;;  %v2234_v50 = vld [vmem:[%s3207_s4 + $0x50] ss:$8 sps:$4 sm:$0xff]  }
 0x130   :  { %v1173_v59 = vmax.f32 %v2761_v12, %v576_v54  ;;  %v578_v60 = vpop.f32.mrb[31].mxu0  ;;  %v1127_v61 = vmax.f32 %v2759_v48, %v749_v56  ;;  %v751_v62 = vpop.f32.mrb[31].mxu1 }
 0x131   :  { %v1174_v39 = vmax.f32 %v2765_v16, %v578_v60  ;;  %v1128_v63 = vmax.f32 %v2763_v15, %v751_v62  ;;  %v1280_v62 = vlaneseq }
 0x135   :  { %v582_v0 = vpop.f32.mrb[32].mxu0  ;;  %v755_v2 = vpop.f32.mrb[32].mxu1 }
 0x136   :  { %v2789_v3 = vmax.f32 %v1155_v23, %v582_v0  ;;  %v584_v4 = vpop.f32.mrb[33].mxu0  ;;  %v2791_v5 = vmax.f32 %v1109_v27, %v755_v2  ;;  %v757_v6 = vpop.f32.mrb[33].mxu1 }
 0x137   :  { %v2793_v8 = vmax.f32 %v1156_v31, %v584_v4  ;;  %v586_v10 = vpop.f32.mrb[34].mxu0  ;;  %v2795_v12 = vmax.f32 %v1110_v34, %v757_v6  ;;  %v759_v48 = vpop.f32.mrb[34].mxu1  ;;  %v2838_v6 = vshrl.u32 %v1280_v62, 7 }
 0x138   :  { %v2797_v14 = vmax.f32 %v1161_v37, %v586_v10  ;;  %v588_v16 = vpop.f32.mrb[35].mxu0  ;;  %v2799_v15 = vmax.f32 %v1115_v38, %v759_v48  ;;  %v761_v18 = vpop.f32.mrb[35].mxu1 }
 0x139   :  { %v2801_v21 = vmax.f32 %v1162_v42, %v588_v16  ;;  %v2803_v23 = vmax.f32 %v1116_v43, %v761_v18 }
 0x13d   :  { %v592_v25 = vpop.f32.mrb[36].mxu0  ;;  %v765_v27 = vpop.f32.mrb[36].mxu1 }
 0x13e   :  { %v2805_v28 = vmax.f32 %v1167_v49, %v592_v25  ;;  %v594_v31 = vpop.f32.mrb[37].mxu0  ;;  %v2807_v32 = vmax.f32 %v1121_v30, %v765_v27  ;;  %v767_v34 = vpop.f32.mrb[37].mxu1  ;;  %v2236_v30 = vld [vmem:[%s3207_s4 + $0x54] ss:$8 sps:$4 sm:$0xff]  }
 0x13f   :  { %v2809_v35 = vmax.f32 %v1168_v53, %v594_v31  ;;  %v596_v37 = vpop.f32.mrb[38].mxu0  ;;  %v2811_v20 = vmax.f32 %v1122_v55, %v767_v34  ;;  %v769_v38 = vpop.f32.mrb[38].mxu1  ;;  %1513 = vmatprep.subr.bf16.mxu1 %v2236_v30  ;;  %v2850_v31 = vsub.s32 0, %v2838_v6 }
 0x140   :  { %v2813_v40 = vmax.f32 %v1173_v59, %v596_v37  ;;  %v598_v42 = vpop.f32.mrb[39].mxu0  ;;  %v2815_v45 = vmax.f32 %v1127_v61, %v769_v38  ;;  %v771_v43 = vpop.f32.mrb[39].mxu1  ;;  %1514 = vmatpush1.bf16.msra.mxu1 %v2234_v50 }
 0x141   :  { %v2817_v46 = vmax.f32 %v1174_v39, %v598_v42  ;;  %v2819_v49 = vmax.f32 %v1128_v63, %v771_v43  ;;  %v2239_v43 = vld [vmem:[%s3207_s4 + $0x64] ss:$8 sps:$4 sm:$0xff]  }
 0x142   :  { %1515 = vmatprep.subr.bf16.mxu1 %v2239_v43 }
 0x145   :  { %v602_v52 = vpop.f32.mrb[40].mxu0  ;;  %v775_v53 = vpop.f32.mrb[40].mxu1 }
 0x146   :  { %v1203_v54 = vmax.f32 %v2789_v3, %v602_v52  ;;  %v604_v55 = vpop.f32.mrb[41].mxu0  ;;  %v1157_v56 = vmax.f32 %v2791_v5, %v775_v53  ;;  %v777_v57 = vpop.f32.mrb[41].mxu1  ;;  %v2011_v5 = vld [vmem:[%s3208_s2 + $0x30] ss:$8 sm:$0xf] }
 0x147   :  { %v1204_v58 = vmax.f32 %v2793_v8, %v604_v55  ;;  %v606_v59 = vpop.f32.mrb[42].mxu0  ;;  %v1158_v60 = vmax.f32 %v2795_v12, %v777_v57  ;;  %v779_v61 = vpop.f32.mrb[42].mxu1  ;;  %v2012_v8 = vld [vmem:[%s3208_s2 + $0x30] ss:$8 sm:$0x30] }
 0x148   :  { %v1209_v39 = vmax.f32 %v2797_v14, %v606_v59  ;;  %v608_v63 = vpop.f32.mrb[43].mxu0  ;;  %v1163_v0 = vmax.f32 %v2799_v15, %v779_v61  ;;  %v781_v2 = vpop.f32.mrb[43].mxu1  ;;  %v2847_v27 = vor.u32 %v2012_v8, %v2011_v5 }
 0x149   :  { %v1210_v4 = vmax.f32 %v2801_v21, %v608_v63  ;;  %v1164_v3 = vmax.f32 %v2803_v23, %v781_v2 }
 0x14d   :  { %v612_v10 = vpop.f32.mrb[44].mxu0  ;;  %v785_v12 = vpop.f32.mrb[44].mxu1 }
 0x14e   :  { %v1215_v48 = vmax.f32 %v2805_v28, %v612_v10  ;;  %v614_v14 = vpop.f32.mrb[45].mxu0  ;;  %v1169_v16 = vmax.f32 %v2807_v32, %v785_v12  ;;  %v787_v15 = vpop.f32.mrb[45].mxu1  ;;  %v2855_v32 = vsub.s32 1, %v2838_v6 }
 0x14f   :  { %v1216_v18 = vmax.f32 %v2809_v35, %v614_v14  ;;  %v616_v21 = vpop.f32.mrb[46].mxu0  ;;  %v1170_v23 = vmax.f32 %v2811_v20, %v787_v15  ;;  %v789_v25 = vpop.f32.mrb[46].mxu1  ;;  %v2237_v20 = vld [vmem:[%s3207_s4 + $0x60] ss:$8 sps:$4 sm:$0xff]  }
 0x150   :  { %v1221_v34 = vmax.f32 %v2813_v40, %v616_v21  ;;  %v618_v37 = vpop.f32.mrb[47].mxu0  ;;  %v1175_v28 = vmax.f32 %v2815_v45, %v789_v25  ;;  %v791_v38 = vpop.f32.mrb[47].mxu1  ;;  %v1283_v40 = vrot.slane %v2847_v27, %v2850_v31  ;;  %1516 = vmatpush1.bf16.msra.mxu1 %v2237_v20  ;;  %v1287_v45 = vrot.slane %v2847_v27, %v2855_v32 }
 0x151   :  { %v1222_v35 = vmax.f32 %v2817_v46, %v618_v37  ;;  %v1176_v42 = vmax.f32 %v2819_v49, %v791_v38 }
 0x152   :  { %v1310_v62 = vadd.f32 %v1283_v40, %v2701_v26  ;;  %v1322_v43 = vadd.f32 %v1283_v40, %v2717_v41  ;;  %v1328_v41 = vadd.f32 %v1283_v40, %v2721_v47 }
 0x155   :  { %v622_v50 = vpop.f32.mrb[48].mxu0  ;;  %v795_v46 = vpop.f32.mrb[48].mxu1 }
 0x156   :  { %v1227_v30 = vmax.f32 %v1203_v54, %v622_v50  ;;  %v624_v49 = vpop.f32.mrb[49].mxu0  ;;  %v2869_v52 = vmax.f32 %v1157_v56, %v795_v46  ;;  %v797_v53 = vpop.f32.mrb[49].mxu1  ;;  %v1311_v54 = vadd.f32 %v1287_v45, %v2703_v29 }
 0x157   :  { %v1228_v55 = vmax.f32 %v1204_v58, %v624_v49  ;;  %v626_v57 = vpop.f32.mrb[50].mxu0  ;;  %v2871_v59 = vmax.f32 %v1158_v60, %v797_v53  ;;  %v799_v61 = vpop.f32.mrb[50].mxu1  ;;  %v1316_v58 = vadd.f32 %v1283_v40, %v2705_v33 }
 0x158   :  { %v1251_v63 = vmax.f32 %v1227_v30, %v2674_v7  ;;  %v1233_v2 = vmax.f32 %v1209_v39, %v626_v57  ;;  %v628_v5 = vpop.f32.mrb[51].mxu0  ;;  %v2875_v8 = vmax.f32 %v1163_v0, %v799_v61  ;;  %v801_v10 = vpop.f32.mrb[51].mxu1  ;;  %v1317_v7 = vadd.f32 %v1287_v45, %v2707_v36 }
 0x159   :  { %v1252_v56 = vmax.f32 %v1228_v55, %v2676_v9  ;;  %v1234_v12 = vmax.f32 %v1210_v4, %v628_v5  ;;  %v2879_v14 = vmax.f32 %v1164_v3, %v801_v10  ;;  %v2240_v55 = vld [vmem:[%s3207_s4 + $0x70] ss:$8 sps:$4 sm:$0xff]  }
 0x15a   :  { %v2882_v60 = vmax.f32 %v1251_v63, %v1310_v62  ;;  %v1257_v26 = vmax.f32 %v1233_v2, %v2678_v11 }
 0x15b   :  { %v2886_v39 = vmax.f32 %v1252_v56, %v1311_v54  ;;  %v1258_v0 = vmax.f32 %v1234_v12, %v2680_v13 }
 0x15c   :  { %v2889_v15 = vmax.f32 %v1257_v26, %v1316_v58 }
 0x15d   :  { %v2891_v29 = vmax.f32 %v1258_v0, %v1317_v7  ;;  %v632_v9 = vpop.f32.mrb[52].mxu0  ;;  %v805_v4 = vpop.f32.mrb[52].mxu1  ;;  %v1358_v3 = vmax.f32 %v2882_v60, %v2886_v39 }
 0x15e   :  { %v1239_v33 = vmax.f32 %v1215_v48, %v632_v9  ;;  %v634_v21 = vpop.f32.mrb[53].mxu0  ;;  %v2895_v25 = vmax.f32 %v1169_v16, %v805_v4  ;;  %v807_v11 = vpop.f32.mrb[53].mxu1  ;;  %v1323_v16 = vadd.f32 %v1287_v45, %v2719_v44  ;;  %v1329_v44 = vadd.f32 %v1287_v45, %v2723_v51 }
 0x15f   :  { %v1240_v37 = vmax.f32 %v1216_v18, %v634_v21  ;;  %v636_v36 = vpop.f32.mrb[54].mxu0  ;;  %v2897_v38 = vmax.f32 %v1170_v23, %v807_v11  ;;  %v809_v20 = vpop.f32.mrb[54].mxu1  ;;  %v1359_v13 = vmax.f32 %v2889_v15, %v2891_v29 }
 0x160   :  { %v1263_v50 = vmax.f32 %v1239_v33, %v2689_v17  ;;  %v1245_v46 = vmax.f32 %v1221_v34, %v636_v36  ;;  %v638_v30 = vpop.f32.mrb[55].mxu0  ;;  %v2903_v49 = vmax.f32 %v1175_v28, %v809_v20  ;;  %v811_v48 = vpop.f32.mrb[55].mxu1  ;;  %v2242_v17 = vld [vmem:[%s3207_s4 + $0x74] ss:$8 sps:$4 sm:$0xff]  }
 0x161   :  { %v1264_v18 = vmax.f32 %v1240_v37, %v2691_v19  ;;  %v1246_v53 = vmax.f32 %v1222_v35, %v638_v30  ;;  %v2907_v23 = vmax.f32 %v1176_v42, %v811_v48  ;;  %1517 = vmatprep.subr.bf16.mxu1 %v2242_v17 }
 0x162   :  { %v2916_v34 = vmax.f32 %v1263_v50, %v1322_v43  ;;  %v1269_v28 = vmax.f32 %v1245_v46, %v2693_v22  ;;  %1518 = vmatpush1.bf16.msra.mxu1 %v2240_v55 }
 0x163   :  { %v2920_v19 = vmax.f32 %v1264_v18, %v1323_v16  ;;  %v1270_v35 = vmax.f32 %v1246_v53, %v2697_v24 }
 0x164   :  { %v2923_v42 = vmax.f32 %v1269_v28, %v1328_v41 }
 0x165   :  { %v2925_v57 = vmax.f32 %v1270_v35, %v1329_v44  ;;  %v928_v61 = vpop.f32.mrb[56].mxu0  ;;  %v815_v62 = vpop.f32.mrb[56].mxu1  ;;  %v1360_v47 = vmax.f32 %v2916_v34, %v2920_v19 }
 0x166   :  { %v2929_v40 = vpop.f32.mrb[57].mxu0  ;;  %v1205_v22 = vmax.f32 %v2869_v52, %v815_v62  ;;  %v817_v51 = vpop.f32.mrb[57].mxu1 }
 0x167   :  { %v2932_v45 = vpop.f32.mrb[58].mxu0  ;;  %v1206_v24 = vmax.f32 %v2871_v59, %v817_v51  ;;  %v819_v63 = vpop.f32.mrb[58].mxu1  ;;  %v1361_v2 = vmax.f32 %v2923_v42, %v2925_v57 }
 0x168   :  { %v2937_v5 = vpop.f32.mrb[59].mxu0  ;;  %v1211_v10 = vmax.f32 %v2875_v8, %v819_v63  ;;  %v821_v54 = vpop.f32.mrb[59].mxu1 }
 0x169   :  { %v1212_v56 = vmax.f32 %v2879_v14, %v821_v54 }
 0x16d   :  { %v2941_v12 = vpop.f32.mrb[60].mxu0  ;;  %v825_v58 = vpop.f32.mrb[60].mxu1 }
 0x16e   :  { %v2943_v52 = vpop.f32.mrb[61].mxu0  ;;  %v1217_v26 = vmax.f32 %v2895_v25, %v825_v58  ;;  %v827_v7 = vpop.f32.mrb[61].mxu1 }
 0x16f   :  { %v2946_v59 = vpop.f32.mrb[62].mxu0  ;;  %v1218_v0 = vmax.f32 %v2897_v38, %v827_v7  ;;  %v829_v9 = vpop.f32.mrb[62].mxu1 }
 0x170   :  { %v2949_v4 = vpop.f32.mrb[63].mxu0  ;;  %v1223_v8 = vmax.f32 %v2903_v49, %v829_v9  ;;  %v831_v33 = vpop.f32.mrb[63].mxu1 }
 0x171   :  { %v1224_v14 = vmax.f32 %v2907_v23, %v831_v33 }
 0x175   :  { %v835_v21 = vpop.f32.mrb[64].mxu1  ;;  %v948_v11 = vpop.f32.mrb[64].mxu0 }
 0x176   :  { %v2953_v37 = vmax.f32 %v1205_v22, %v835_v21  ;;  %v1111_v36 = vmax.f32 %v928_v61, %v948_v11  ;;  %v837_v20 = vpop.f32.mrb[65].mxu1  ;;  %v950_v25 = vpop.f32.mrb[65].mxu0 }
 0x177   :  { %v2955_v43 = vmax.f32 %v1206_v24, %v837_v20  ;;  %v1112_v50 = vmax.f32 %v2929_v40, %v950_v25  ;;  %v839_v38 = vpop.f32.mrb[66].mxu1  ;;  %v952_v46 = vpop.f32.mrb[66].mxu0 }
 0x178   :  { %v2958_v30 = vmax.f32 %v1211_v10, %v839_v38  ;;  %v1117_v49 = vmax.f32 %v2932_v45, %v952_v46  ;;  %v841_v48 = vpop.f32.mrb[67].mxu1  ;;  %v954_v16 = vpop.f32.mrb[67].mxu0 }
 0x179   :  { %v2961_v18 = vmax.f32 %v1212_v56, %v841_v48  ;;  %v1118_v53 = vmax.f32 %v2937_v5, %v954_v16  ;;  %v1294_v48 = vsub.s32 3, %v2838_v6 }
 0x17d   :  { %v845_v23 = vpop.f32.mrb[68].mxu1  ;;  %v958_v55 = vpop.f32.mrb[68].mxu0 }
 0x17e   :  { %v2964_v17 = vmax.f32 %v1217_v26, %v845_v23  ;;  %v1123_v41 = vmax.f32 %v2941_v12, %v958_v55  ;;  %v847_v28 = vpop.f32.mrb[69].mxu1  ;;  %v960_v44 = vpop.f32.mrb[69].mxu0 }
 0x17f   :  { %v2967_v35 = vmax.f32 %v1218_v0, %v847_v28  ;;  %v1124_v61 = vmax.f32 %v2943_v52, %v960_v44  ;;  %v849_v62 = vpop.f32.mrb[70].mxu1  ;;  %v962_v40 = vpop.f32.mrb[70].mxu0  ;;  %v1295_v28 = vrot.slane %v2847_v27, %v1294_v48 }
 0x180   :  { %v2970_v22 = vmax.f32 %v1223_v8, %v849_v62  ;;  %v1129_v51 = vmax.f32 %v2946_v59, %v962_v40  ;;  %v851_v45 = vpop.f32.mrb[71].mxu1  ;;  %v964_v24 = vpop.f32.mrb[71].mxu0 }
 0x181   :  { %v2973_v63 = vmax.f32 %v1224_v14, %v851_v45  ;;  %v1130_v5 = vmax.f32 %v2949_v4, %v964_v24 }
 0x185   :  { %v855_v10 = vpop.f32.mrb[72].mxu1  ;;  %v968_v54 = vpop.f32.mrb[72].mxu0 }
 0x186   :  { %v1253_v56 = vmax.f32 %v2953_v37, %v855_v10  ;;  %v2977_v12 = vmax.f32 %v1111_v36, %v968_v54  ;;  %v857_v58 = vpop.f32.mrb[73].mxu1  ;;  %v970_v52 = vpop.f32.mrb[73].mxu0 }
 0x187   :  { %v1254_v26 = vmax.f32 %v2955_v43, %v857_v58  ;;  %v2980_v7 = vmax.f32 %v1112_v50, %v970_v52  ;;  %v859_v0 = vpop.f32.mrb[74].mxu1  ;;  %v972_v59 = vpop.f32.mrb[74].mxu0  ;;  %v1290_v50 = vsub.s32 2, %v2838_v6 }
 0x188   :  { %v1259_v9 = vmax.f32 %v2958_v30, %v859_v0  ;;  %v2983_v8 = vmax.f32 %v1117_v49, %v972_v59  ;;  %v861_v33 = vpop.f32.mrb[75].mxu1  ;;  %v974_v4 = vpop.f32.mrb[75].mxu0 }
 0x189   :  { %v1260_v14 = vmax.f32 %v2961_v18, %v861_v33  ;;  %v2986_v21 = vmax.f32 %v1118_v53, %v974_v4 }
 0x18d   :  { %v865_v11 = vpop.f32.mrb[76].mxu1  ;;  %v978_v37 = vpop.f32.mrb[76].mxu0 }
 0x18e   :  { %v1265_v36 = vmax.f32 %v2964_v17, %v865_v11  ;;  %v2989_v20 = vmax.f32 %v1123_v41, %v978_v37  ;;  %v867_v25 = vpop.f32.mrb[77].mxu1  ;;  %v980_v43 = vpop.f32.mrb[77].mxu0  ;;  %v1291_v41 = vrot.slane %v2847_v27, %v1290_v50 }
 0x18f   :  { %v1266_v38 = vmax.f32 %v2967_v35, %v867_v25  ;;  %v2993_v46 = vmax.f32 %v1124_v61, %v980_v43  ;;  %v869_v30 = vpop.f32.mrb[78].mxu1  ;;  %v982_v49 = vpop.f32.mrb[78].mxu0 }
 0x190   :  { %v1271_v16 = vmax.f32 %v2970_v22, %v869_v30  ;;  %v2997_v18 = vmax.f32 %v1129_v51, %v982_v49  ;;  %v871_v53 = vpop.f32.mrb[79].mxu1  ;;  %v984_v23 = vpop.f32.mrb[79].mxu0 }
 0x191   :  { %v1272_v55 = vmax.f32 %v2973_v63, %v871_v53  ;;  %v3000_v17 = vmax.f32 %v1130_v5, %v984_v23 }
 0x195   :  { %v875_v44 = vpop.f32.mrb[80].mxu1  ;;  %v988_v35 = vpop.f32.mrb[80].mxu0 }
 0x196   :  { %v1312_v61 = vadd.f32 %v1291_v41, %v875_v44  ;;  %v1159_v62 = vmax.f32 %v2977_v12, %v988_v35  ;;  %v877_v40 = vpop.f32.mrb[81].mxu1  ;;  %v990_v45 = vpop.f32.mrb[81].mxu0 }
 0x197   :  { %v1313_v22 = vadd.f32 %v1295_v28, %v877_v40  ;;  %v1160_v51 = vmax.f32 %v2980_v7, %v990_v45  ;;  %v879_v24 = vpop.f32.mrb[82].mxu1  ;;  %v992_v10 = vpop.f32.mrb[82].mxu0 }
 0x198   :  { %v1336_v54 = vmax.f32 %v1253_v56, %v1312_v61  ;;  %v1318_v63 = vadd.f32 %v1291_v41, %v879_v24  ;;  %v1165_v5 = vmax.f32 %v2983_v8, %v992_v10  ;;  %v881_v58 = vpop.f32.mrb[83].mxu1  ;;  %v994_v52 = vpop.f32.mrb[83].mxu0 }
 0x199   :  { %v3007_v0 = vmax.f32 %v1254_v26, %v1313_v22  ;;  %v1319_v59 = vadd.f32 %v1295_v28, %v881_v58  ;;  %v1166_v33 = vmax.f32 %v2986_v21, %v994_v52 }
 0x19a   :  { %v3013_v12 = vmax.f32 %v1358_v3, %v1336_v54  ;;  %v1342_v4 = vmax.f32 %v1259_v9, %v1318_v63 }
 0x19b   :  { %v3015_v7 = vmax.f32 %v1260_v14, %v1319_v59 }
 0x19c   :  { %v1366_v56 = vmax.f32 %v3013_v12, %v3007_v0  ;;  %v3022_v8 = vmax.f32 %v1359_v13, %v1342_v4 }
 0x19d   :  { %v885_v26 = vpop.f32.mrb[84].mxu1  ;;  %v998_v11 = vpop.f32.mrb[84].mxu0 }
 0x19e   :  { %v1367_v21 = vmax.f32 %v3022_v8, %v3015_v7  ;;  %v1324_v37 = vadd.f32 %v1291_v41, %v885_v26  ;;  %v1171_v60 = vmax.f32 %v2989_v20, %v998_v11  ;;  %v887_v39 = vpop.f32.mrb[85].mxu1  ;;  %v1000_v3 = vpop.f32.mrb[85].mxu0 }
 0x19f   :  { %v1325_v9 = vadd.f32 %v1295_v28, %v887_v39  ;;  %v1172_v14 = vmax.f32 %v2993_v46, %v1000_v3  ;;  %v889_v25 = vpop.f32.mrb[86].mxu1  ;;  %v1002_v43 = vpop.f32.mrb[86].mxu0 }
 0x1a0   :  { %v1348_v50 = vmax.f32 %v1265_v36, %v1324_v37  ;;  %v1330_v30 = vadd.f32 %v1291_v41, %v889_v25  ;;  %v1177_v15 = vmax.f32 %v2997_v18, %v1002_v43  ;;  %v891_v29 = vpop.f32.mrb[87].mxu1  ;;  %v1004_v13 = vpop.f32.mrb[87].mxu0 }
 0x1a1   :  { %v3029_v49 = vmax.f32 %v1266_v38, %v1325_v9  ;;  %v1331_v48 = vadd.f32 %v1295_v28, %v891_v29  ;;  %v1178_v53 = vmax.f32 %v3000_v17, %v1004_v13 }
 0x1a2   :  { %v3035_v20 = vmax.f32 %v1360_v47, %v1348_v50  ;;  %v1354_v23 = vmax.f32 %v1271_v16, %v1330_v30 }
 0x1a3   :  { %v3037_v46 = vmax.f32 %v1272_v55, %v1331_v48 }
 0x1a4   :  { %v1368_v36 = vmax.f32 %v3035_v20, %v3029_v49  ;;  %v3044_v18 = vmax.f32 %v1361_v2, %v1354_v23 }
 0x1a5   :  { %v1008_v38 = vpop.f32.mrb[88].mxu0 }
 0x1a6   :  { %v1369_v17 = vmax.f32 %v3044_v18, %v3037_v46  ;;  %v1183_v41 = vmax.f32 %v1159_v62, %v1008_v38  ;;  %v1010_v28 = vpop.f32.mrb[89].mxu0  ;;  %v2245_v46 = vld [vmem:[%s3210_s6 + $0x4] ss:$8 sps:$4 sm:$0xff]   ;;  %v2243_v18 = vld [vmem:[%s3210_s6] ss:$8 sps:$4 sm:$0xff]  }
 0x1a7   :  { %v1184_v34 = vmax.f32 %v1160_v51, %v1010_v28  ;;  %v1012_v19 = vpop.f32.mrb[90].mxu0  ;;  %1706 = vmatprep.subr.bf16.mxu1 %v2245_v46 }
 0x1a8   :  { %v1189_v47 = vmax.f32 %v1165_v5, %v1012_v19  ;;  %v1014_v16 = vpop.f32.mrb[91].mxu0 }
 0x1a9   :  { %v1190_v55 = vmax.f32 %v1166_v33, %v1014_v16 }
 0x1ad   :  { %v1018_v44 = vpop.f32.mrb[92].mxu0 }
 0x1ae   :  { %v1195_v35 = vmax.f32 %v1171_v60, %v1018_v44  ;;  %v1020_v61 = vpop.f32.mrb[93].mxu0 }
 0x1af   :  { %v1196_v40 = vmax.f32 %v1172_v14, %v1020_v61  ;;  %v1022_v45 = vpop.f32.mrb[94].mxu0 }
 0x1b0   :  { %v1201_v22 = vmax.f32 %v1177_v15, %v1022_v45  ;;  %v1024_v42 = vpop.f32.mrb[95].mxu0  ;;  %v1298_v45 = vsub.s32 4, %v2838_v6 }
 0x1b1   :  { %v1202_v57 = vmax.f32 %v1178_v53, %v1024_v42 }
 0x1b5   :  { %v1028_v2 = vpop.f32.mrb[96].mxu0 }
 0x1b6   :  { %v1207_v24 = vmax.f32 %v1183_v41, %v1028_v2  ;;  %v1030_v10 = vpop.f32.mrb[97].mxu0 }
 0x1b7   :  { %v1208_v54 = vmax.f32 %v1184_v34, %v1030_v10  ;;  %v1032_v63 = vpop.f32.mrb[98].mxu0 }
 0x1b8   :  { %v1213_v62 = vmax.f32 %v1189_v47, %v1032_v63  ;;  %v1034_v58 = vpop.f32.mrb[99].mxu0 }
 0x1b9   :  { %v1214_v51 = vmax.f32 %v1190_v55, %v1034_v58 }
 0x1bd   :  { %v1038_v52 = vpop.f32.mrb[100].mxu0 }
 0x1be   :  { %v1219_v5 = vmax.f32 %v1195_v35, %v1038_v52  ;;  %v1040_v59 = vpop.f32.mrb[101].mxu0 }
 0x1bf   :  { %v1220_v33 = vmax.f32 %v1196_v40, %v1040_v59  ;;  %v1042_v4 = vpop.f32.mrb[102].mxu0 }
 0x1c0   :  { %v1225_v26 = vmax.f32 %v1201_v22, %v1042_v4  ;;  %v1044_v11 = vpop.f32.mrb[103].mxu0 }
 0x1c1   :  { %v1226_v37 = vmax.f32 %v1202_v57, %v1044_v11  ;;  %v1302_v57 = vsub.s32 5, %v2838_v6 }
 0x1c3   :  { %v1303_v63 = vrot.slane %v2847_v27, %v1302_v57  ;;  %v2263_v57 = vld [vmem:[%s3210_s6 + $0x64] ss:$8 sps:$4 sm:$0xff]  }
 0x1c5   :  { %v1048_v60 = vpop.f32.mrb[104].mxu0 }
 0x1c6   :  { %v1231_v39 = vmax.f32 %v1207_v24, %v1048_v60  ;;  %v1050_v3 = vpop.f32.mrb[105].mxu0  ;;  %v2013_v60 = vld [vmem:[%s3209_s3] ss:$0 sm:$0xff] }
 0x1c7   :  { %v1232_v9 = vmax.f32 %v1208_v54, %v1050_v3  ;;  %v1052_v14 = vpop.f32.mrb[106].mxu0  ;;  %v1299_v54 = vrot.slane %v2847_v27, %v1298_v45  ;;  %v2255_v45 = vld [vmem:[%s3210_s6 + $0x40] ss:$8 sps:$4 sm:$0xff]  }
 0x1c8   :  { %v1237_v25 = vmax.f32 %v1213_v62, %v1052_v14  ;;  %v1054_v43 = vpop.f32.mrb[107].mxu0 }
 0x1c9   :  { %v1238_v50 = vmax.f32 %v1214_v51, %v1054_v43 }
 0x1cd   :  { %v1058_v30 = vpop.f32.mrb[108].mxu0 }
 0x1ce   :  { %v1243_v15 = vmax.f32 %v1219_v5, %v1058_v30  ;;  %v1060_v29 = vpop.f32.mrb[109].mxu0 }
 0x1cf   :  { %v1244_v13 = vmax.f32 %v1220_v33, %v1060_v29  ;;  %v1062_v48 = vpop.f32.mrb[110].mxu0 }
 0x1d0   :  { %v1249_v53 = vmax.f32 %v1225_v26, %v1062_v48  ;;  %v1064_v23 = vpop.f32.mrb[111].mxu0 }
 0x1d1   :  { %v1250_v38 = vmax.f32 %v1226_v37, %v1064_v23 }
 0x1d5   :  { %v1068_v41 = vpop.f32.mrb[112].mxu0 }
 0x1d6   :  { %v1255_v28 = vmax.f32 %v1231_v39, %v1068_v41  ;;  %v1070_v34 = vpop.f32.mrb[113].mxu0 }
 0x1d7   :  { %v1256_v19 = vmax.f32 %v1232_v9, %v1070_v34  ;;  %v1072_v47 = vpop.f32.mrb[114].mxu0 }
 0x1d8   :  { %v1261_v16 = vmax.f32 %v1237_v25, %v1072_v47  ;;  %v1074_v55 = vpop.f32.mrb[115].mxu0 }
 0x1d9   :  { %v1262_v44 = vmax.f32 %v1238_v50, %v1074_v55  ;;  %v2251_v55 = vld [vmem:[%s3210_s6 + $0x24] ss:$8 sps:$4 sm:$0xff]  }
 0x1dd   :  { %v1078_v35 = vpop.f32.mrb[116].mxu0 }
 0x1de   :  { %v1267_v61 = vmax.f32 %v1243_v15, %v1078_v35  ;;  %v1080_v40 = vpop.f32.mrb[117].mxu0  ;;  %v2254_v35 = vld [vmem:[%s3210_s6 + $0x34] ss:$8 sps:$4 sm:$0xff]  }
 0x1df   :  { %v1268_v22 = vmax.f32 %v1244_v13, %v1080_v40  ;;  %v1082_v42 = vpop.f32.mrb[118].mxu0  ;;  %v2257_v40 = vld [vmem:[%s3210_s6 + $0x44] ss:$8 sps:$4 sm:$0xff]  }
 0x1e0   :  { %v1273_v2 = vmax.f32 %v1249_v53, %v1082_v42  ;;  %v1084_v24 = vpop.f32.mrb[119].mxu0  ;;  %v2258_v42 = vld [vmem:[%s3210_s6 + $0x50] ss:$8 sps:$4 sm:$0xff]  }
 0x1e1   :  { %v1274_v10 = vmax.f32 %v1250_v38, %v1084_v24  ;;  %v2264_v24 = vld [vmem:[%s3210_s6 + $0x70] ss:$8 sps:$4 sm:$0xff]  }
 0x1e5   :  { %v1088_v62 = vpop.f32.mrb[120].mxu0 }
 0x1e6   :  { %v1314_v58 = vadd.f32 %v1299_v54, %v1088_v62  ;;  %v1090_v51 = vpop.f32.mrb[121].mxu0 }
 0x1e7   :  { %v1315_v52 = vadd.f32 %v1303_v63, %v1090_v51  ;;  %v1092_v5 = vpop.f32.mrb[122].mxu0 }
 0x1e8   :  { %v1338_v59 = vmax.f32 %v1255_v28, %v1314_v58  ;;  %v1320_v33 = vadd.f32 %v1299_v54, %v1092_v5  ;;  %v1094_v4 = vpop.f32.mrb[123].mxu0 }
 0x1e9   :  { %v1339_v26 = vmax.f32 %v1256_v19, %v1315_v52  ;;  %v1321_v11 = vadd.f32 %v1303_v63, %v1094_v4 }
 0x1ea   :  { %v1370_v6 = vmax.f32 %v1366_v56, %v1338_v59  ;;  %v1344_v37 = vmax.f32 %v1261_v16, %v1320_v33  ;;  %v2246_v16 = vld [vmem:[%s3210_s6 + $0x10] ss:$8 sps:$4 sm:$0xff]  }
 0x1eb   :  { %v1345_v27 = vmax.f32 %v1262_v44, %v1321_v11  ;;  %v2249_v44 = vld [vmem:[%s3210_s6 + $0x20] ss:$8 sps:$4 sm:$0xff]  }
 0x1ec   :  { %v1374_v39 = vmax.f32 %v1370_v6, %v1339_v26  ;;  %v1371_v3 = vmax.f32 %v1367_v21, %v1344_v37 }
 0x1ed   :  { %v1098_v9 = vpop.f32.mrb[124].mxu0 }
 0x1ee   :  { %v3061_v14 = vadd.f32 %v2013_v60, %v1374_v39  ;;  %v1375_v25 = vmax.f32 %v1371_v3, %v1345_v27  ;;  %v1326_v43 = vadd.f32 %v1299_v54, %v1098_v9  ;;  %v1100_v50 = vpop.f32.mrb[125].mxu0 }
 0x1ef   :  { %v1327_v30 = vadd.f32 %v1303_v63, %v1100_v50  ;;  %v1102_v0 = vpop.f32.mrb[126].mxu0 }
 0x1f0   :  { %v3063_v12 = vadd.f32 %v2013_v60, %v1375_v25  ;;  %v1350_v56 = vmax.f32 %v1267_v61, %v1326_v43  ;;  %v1332_v15 = vadd.f32 %v1299_v54, %v1102_v0  ;;  %v1104_v29 = vpop.f32.mrb[127].mxu0  ;;  %v1389_v53 = vmax.f32 %v3061_v14, 0.0  ;;  %v2252_v61 = vld [vmem:[%s3210_s6 + $0x30] ss:$8 sps:$4 sm:$0xff]   ;;  %v1411_v54 = vld [vmem:[%s3211_s5] sm:$0x3] }
 0x1f1   :  { %v1351_v13 = vmax.f32 %v1268_v22, %v1327_v30  ;;  %v1333_v48 = vadd.f32 %v1303_v63, %v1104_v29  ;;  %v2260_v22 = vld [vmem:[%s3210_s6 + $0x54] ss:$8 sps:$4 sm:$0xff]   ;;  %v1420_v63 = vrot.slane %v1411_v54, %v2855_v32  ;;  %v1416_v25 = vrot.slane %v1411_v54, %v2850_v31 }
 0x1f2   :  { %v1390_v7 = vmax.f32 %v3063_v12, 0.0  ;;  %v1372_v8 = vmax.f32 %v1368_v36, %v1350_v56  ;;  %v1356_v21 = vmax.f32 %v1273_v2, %v1332_v15  ;;  %v2261_v2 = vld [vmem:[%s3210_s6 + $0x60] ss:$8 sps:$4 sm:$0xff]  }
 0x1f3   :  { %v1357_v23 = vmax.f32 %v1274_v10, %v1333_v48  ;;  %v2266_v10 = vld [vmem:[%s3210_s6 + $0x74] ss:$8 sps:$4 sm:$0xff]  }
 0x1f4   :  { %v1393_v38 = vpack.c.bf16 %v1390_v7, %v1389_v53  ;;  %v1376_v41 = vmax.f32 %v1372_v8, %v1351_v13  ;;  %v1373_v28 = vmax.f32 %v1369_v17, %v1356_v21  ;;  %v2248_v17 = vld [vmem:[%s3210_s6 + $0x14] ss:$8 sps:$4 sm:$0xff]  }
 0x1f6   :  { %v1377_v34 = vmax.f32 %v1373_v28, %v1357_v23  ;;  %1536 = vmatmul.mubr.bf16.vlgmr.msra.gmra.mrb[88].mxu1 %v1393_v38  ;;  %v3077_v19 = vadd.f32 %v2013_v60, %v1376_v41 }
 0x1f7   :  { %1545 = vmatprep.mubr.bf16.mxu1 %v2307_v1  ;;  %1707 = vmatpush1.bf16.msra.mxu1 %v2243_v18 }
 0x1f8   :  { %v3080_v49 = vadd.f32 %v2013_v60, %v1377_v34  ;;  %v1391_v20 = vmax.f32 %v3077_v19, 0.0  ;;  %1708 = vmatprep.subr.bf16.mxu1 %v2248_v17 }
 0x1fa   :  { %v1392_v36 = vmax.f32 %v3080_v49, 0.0  ;;  %v2268_v49 = vld [vmem:[%s3212_s8 + $0x8] sm:$0xff]  }
 0x1fb   :  { %1709 = vmatpush1.bf16.msra.mxu1 %v2246_v16 }
 0x1fc   :  { %v1394_v47 = vpack.c.bf16 %v1392_v36, %v1391_v20  ;;  %1710 = vmatprep.subr.bf16.mxu1 %v2251_v55 }
 0x1fe   :  { %1546 = vmatmul.mubr.bf16.gmra.mrb[92].mxu1 %v1394_v47 }
 0x1ff   :  { %1738 = vmatprep.mubr.bf16.mxu1 %v2307_v1  ;;  %1711 = vmatpush1.bf16.msra.mxu1 %v2249_v44 }
 0x200   :  { %1712 = vmatprep.subr.bf16.mxu1 %v2254_v35 }
 0x203   :  { %1713 = vmatpush1.bf16.msra.mxu1 %v2252_v61 }
 0x204   :  { %1714 = vmatprep.subr.bf16.mxu1 %v2257_v40 }
 0x207   :  { %1715 = vmatpush1.bf16.msra.mxu1 %v2255_v45 }
 0x208   :  { %1716 = vmatprep.subr.bf16.mxu1 %v2260_v22 }
 0x20b   :  { %1717 = vmatpush1.bf16.msra.mxu1 %v2258_v42  ;;  %v2271_v42 = vld [vmem:[%s3212_s8 + $0x20] sm:$0xff]  }
 0x20c   :  { %1718 = vmatprep.subr.bf16.mxu1 %v2263_v57  ;;  %v2272_v57 = vld [vmem:[%s3212_s8 + $0x28] sm:$0xff]  }
 0x20f   :  { %1719 = vmatpush1.bf16.msra.mxu1 %v2261_v2  ;;  %v2273_v2 = vld [vmem:[%s3212_s8 + $0x30] sm:$0xff]  }
 0x210   :  { %1720 = vmatprep.subr.bf16.mxu1 %v2266_v10  ;;  %v1614_v10 = vld [vmem:[%s3213_s7] sm:$0x3] }
 0x211   :  { %v1623_v54 = vrot.slane %v1614_v10, %v2855_v32 }
 0x213   :  { %1721 = vmatpush1.bf16.msra.mxu1 %v2264_v24  ;;  %v2274_v24 = vld [vmem:[%s3212_s8 + $0x38] sm:$0xff]  }
 0x2c9   :  { %v1537_v62 = vpop.f32.mrb[88].mxu1 }
 0x2ca   :  { %v1539_v58 = vpop.f32.mrb[89].mxu1  ;;  %v1538_v0 = vadd.f32 %v1537_v62, %v1416_v25 }
 0x2cb   :  { %v1540_v51 = vadd.f32 %v1539_v58, %v1420_v63  ;;  %v1541_v52 = vpop.f32.mrb[90].mxu1 }
 0x2cc   :  { %v1543_v5 = vpop.f32.mrb[91].mxu1  ;;  %v1542_v56 = vadd.f32 %v1541_v52, %v1416_v25  ;;  %v1556_v29 = vmax.f32 %v1538_v0, 0.0 }
 0x2cd   :  { %v2030_v59 = vmul.f32 -1.442695, %v1540_v51  ;;  %v1544_v33 = vadd.f32 %v1543_v5, %v1420_v63 }
 0x2ce   :  { %v1557_v8 = vmax.f32 %v1542_v56, 0.0  ;;  %v1584_v23 = vsub.f32 %v1389_v53, %v1556_v29 }
 0x2cf   :  { %2275 = vpow2.f32 %v2030_v59  ;;  %v2031_v4 = vmul.f32 -1.442695, %v1544_v33 }
 0x2d0   :  { %v1585_v34 = vsub.f32 %v1390_v7, %v1557_v8 }
 0x2d1   :  { %2277 = vpow2.f32 %v2031_v4  ;;  %v1547_v26 = vpop.f32.mrb[92].mxu1 }
 0x2d2   :  { %v1549_v11 = vpop.f32.mrb[93].mxu1  ;;  %v1548_v38 = vadd.f32 %v1547_v26, %v1416_v25 }
 0x2d3   :  { %v1550_v6 = vadd.f32 %v1549_v11, %v1420_v63  ;;  %v1551_v37 = vpop.f32.mrb[94].mxu1 }
 0x2d4   :  { %v1553_v60 = vpop.f32.mrb[95].mxu1  ;;  %v1552_v47 = vadd.f32 %v1551_v37, %v1416_v25  ;;  %v1558_v17 = vmax.f32 %v1548_v38, 0.0 }
 0x2d5   :  { %v2032_v27 = vmul.f32 -1.442695, %v1550_v6  ;;  %v1554_v39 = vadd.f32 %v1553_v60, %v1420_v63 }
 0x2d6   :  { %v1559_v55 = vmax.f32 %v1552_v47, 0.0  ;;  %v1586_v14 = vsub.f32 %v1391_v20, %v1558_v17  ;;  %v2267_v20 = vld [vmem:[%s3212_s8] sm:$0xff]  }
 0x2d7   :  { %2279 = vpow2.f32 %v2032_v27  ;;  %v2033_v3 = vmul.f32 -1.442695, %v1554_v39  ;;  %2092 = vmatprep.subr.bf16.mxu1 %v2267_v20 }
 0x2d8   :  { %v1587_v12 = vsub.f32 %v1392_v36, %v1559_v55  ;;  %v2270_v36 = vld [vmem:[%s3212_s8 + $0x18] sm:$0xff]  }
 0x2d9   :  { %v2276_v9 = vpop.eup %2275  ;;  %2281 = vpow2.f32 %v2033_v3  ;;  %v1619_v3 = vrot.slane %v1614_v10, %v2850_v31 }
 0x2da   :  { %v1572_v43 = vadd.f32 1.0, %v2276_v9 }
 0x2db   :  { %v2278_v50 = vpop.eup %2277 }
 0x2dc   :  { %2283 = vrcp.f32 %v1572_v43  ;;  %v1573_v30 = vadd.f32 1.0, %v2278_v50 }
 0x2de   :  { %2285 = vrcp.f32 %v1573_v30 }
 0x2e1   :  { %v2280_v15 = vpop.eup %2279 }
 0x2e2   :  { %v1574_v13 = vadd.f32 1.0, %v2280_v15 }
 0x2e3   :  { %v2282_v48 = vpop.eup %2281 }
 0x2e4   :  { %2287 = vrcp.f32 %v1574_v13  ;;  %v1575_v21 = vadd.f32 1.0, %v2282_v48 }
 0x2e6   :  { %v2284_v41 = vpop.eup %2283  ;;  %2289 = vrcp.f32 %v1575_v21 }
 0x2e7   :  { %v1588_v28 = vmul.f32 %v2284_v41, %v1584_v23 }
 0x2e8   :  { %v2286_v46 = vpop.eup %2285 }
 0x2e9   :  { %v1589_v18 = vmul.f32 %v2286_v46, %v1585_v34  ;;  %v3146_v16 = vadd.f32 %v1588_v28, %v1556_v29 }
 0x2eb   :  { %v3148_v44 = vadd.f32 %v1589_v18, %v1557_v8 }
 0x2ed   :  { %v1596_v53 = vpack.c.bf16 %v3148_v44, %v3146_v16 }
 0x2ee   :  { %v2288_v35 = vpop.eup %2287 }
 0x2ef   :  { %1739 = vmatmul.mubr.bf16.vlgmr.msra.gmra.mrb[96].mxu1 %v1596_v53  ;;  %v1590_v7 = vmul.f32 %v2288_v35, %v1586_v14 }
 0x2f0   :  { %v2290_v61 = vpop.eup %2289  ;;  %1748 = vmatprep.mubr.bf16.mxu1 %v2307_v1  ;;  %2093 = vmatpush3.bf16.msra.mxu1 %v2267_v20  ;;  %v2269_v1 = vld [vmem:[%s3212_s8 + $0x10] sm:$0xff]   ;;  %v2054_v20 = vld [vmem:[%s3214_s9] ss:$0 sm:$0xff] }
 0x2f1   :  { %v1591_v40 = vmul.f32 %v2290_v61, %v1587_v12  ;;  %v3157_v45 = vadd.f32 %v1590_v7, %v1558_v17  ;;  %2094 = vmatprep.subr.bf16.mxu1 %v2268_v49 }
 0x2f3   :  { %v3159_v22 = vadd.f32 %v1591_v40, %v1559_v55 }
 0x2f4   :  { %2095 = vmatpush3.bf16.msra.mxu1 %v2268_v49 }
 0x2f5   :  { %v1597_v19 = vpack.c.bf16 %v3159_v22, %v3157_v45  ;;  %2096 = vmatprep.subr.bf16.mxu1 %v2269_v1 }
 0x2f7   :  { %1749 = vmatmul.mubr.bf16.gmra.mrb[100].mxu1 %v1597_v19 }
 0x2f8   :  { %2097 = vmatpush3.bf16.msra.mxu1 %v2269_v1 }
 0x2f9   :  { %2098 = vmatprep.subr.bf16.mxu1 %v2270_v36 }
 0x2fc   :  { %2099 = vmatpush3.bf16.msra.mxu1 %v2270_v36 }
 0x2fd   :  { %2100 = vmatprep.subr.bf16.mxu1 %v2271_v42 }
 0x300   :  { %2101 = vmatpush3.bf16.msra.mxu1 %v2271_v42 }
 0x301   :  { %2102 = vmatprep.subr.bf16.mxu1 %v2272_v57 }
 0x304   :  { %2103 = vmatpush3.bf16.msra.mxu1 %v2272_v57 }
 0x305   :  { %2104 = vmatprep.subr.bf16.mxu1 %v2273_v2 }
 0x308   :  { %2105 = vmatpush3.bf16.msra.mxu1 %v2273_v2 }
 0x309   :  { %2106 = vmatprep.subr.bf16.mxu1 %v2274_v24 }
 0x30c   :  { %2107 = vmatpush3.bf16.msra.mxu1 %v2274_v24 }
 0x3c2   :  { %v1740_v63 = vpop.f32.mrb[96].mxu1 }
 0x3c3   :  { %v1742_v62 = vpop.f32.mrb[97].mxu1  ;;  %v1741_v50 = vadd.f32 %v1740_v63, %v1619_v3 }
 0x3c4   :  { %v1743_v58 = vadd.f32 %v1742_v62, %v1623_v54  ;;  %v1744_v51 = vpop.f32.mrb[98].mxu1 }
 0x3c5   :  { %v1746_v52 = vpop.f32.mrb[99].mxu1  ;;  %v1745_v30 = vadd.f32 %v1744_v51, %v1619_v3  ;;  %v1759_v56 = vmax.f32 %v1741_v50, 0.0 }
 0x3c6   :  { %v2050_v5 = vmul.f32 -1.442695, %v1743_v58  ;;  %v1747_v59 = vadd.f32 %v1746_v52, %v1623_v54 }
 0x3c7   :  { %v1760_v13 = vmax.f32 %v1745_v30, 0.0  ;;  %v1787_v8 = vsub.f32 %v3146_v16, %v1759_v56 }
 0x3c8   :  { %2291 = vpow2.f32 %v2050_v5  ;;  %v2051_v33 = vmul.f32 -1.442695, %v1747_v59 }
 0x3c9   :  { %v1788_v31 = vsub.f32 %v3148_v44, %v1760_v13 }
 0x3ca   :  { %2293 = vpow2.f32 %v2051_v33  ;;  %v1750_v4 = vpop.f32.mrb[100].mxu1 }
 0x3cb   :  { %v1752_v26 = vpop.f32.mrb[101].mxu1  ;;  %v1751_v21 = vadd.f32 %v1750_v4, %v1619_v3 }
 0x3cc   :  { %v1753_v11 = vadd.f32 %v1752_v26, %v1623_v54  ;;  %v1754_v6 = vpop.f32.mrb[102].mxu1 }
 0x3cd   :  { %v1756_v37 = vpop.f32.mrb[103].mxu1  ;;  %v1755_v38 = vadd.f32 %v1754_v6, %v1619_v3  ;;  %v1761_v34 = vmax.f32 %v1751_v21, 0.0 }
 0x3ce   :  { %v2052_v60 = vmul.f32 -1.442695, %v1753_v11  ;;  %v1757_v27 = vadd.f32 %v1756_v37, %v1623_v54 }
 0x3cf   :  { %v1762_v18 = vmax.f32 %v1755_v38, 0.0  ;;  %v1789_v55 = vsub.f32 %v3157_v45, %v1761_v34 }
 0x3d0   :  { %2295 = vpow2.f32 %v2052_v60  ;;  %v2053_v39 = vmul.f32 -1.442695, %v1757_v27 }
 0x3d1   :  { %v1790_v16 = vsub.f32 %v3159_v22, %v1762_v18 }
 0x3d2   :  { %v2292_v32 = vpop.eup %2291  ;;  %2297 = vpow2.f32 %v2053_v39 }
 0x3d3   :  { %v1775_v9 = vadd.f32 1.0, %v2292_v32 }
 0x3d4   :  { %v2294_v25 = vpop.eup %2293 }
 0x3d5   :  { %2299 = vrcp.f32 %v1775_v9  ;;  %v1776_v43 = vadd.f32 1.0, %v2294_v25 }
 0x3d7   :  { %2301 = vrcp.f32 %v1776_v43 }
 0x3da   :  { %v2296_v0 = vpop.eup %2295 }
 0x3db   :  { %v1777_v15 = vadd.f32 1.0, %v2296_v0 }
 0x3dc   :  { %v2298_v29 = vpop.eup %2297 }
 0x3dd   :  { %2303 = vrcp.f32 %v1777_v15  ;;  %v1778_v48 = vadd.f32 1.0, %v2298_v29 }
 0x3df   :  { %v2300_v23 = vpop.eup %2299  ;;  %2305 = vrcp.f32 %v1778_v48 }
 0x3e0   :  { %v1791_v41 = vmul.f32 %v2300_v23, %v1787_v8 }
 0x3e1   :  { %v2302_v28 = vpop.eup %2301 }
 0x3e2   :  { %v1792_v47 = vmul.f32 %v2302_v28, %v1788_v31  ;;  %v1795_v46 = vadd.f32 %v1791_v41, %v1759_v56 }
 0x3e4   :  { %v1796_v17 = vadd.f32 %v1792_v47, %v1760_v13 }
 0x3e6   :  { %v1799_v14 = vpack.c.bf16 %v1796_v17, %v1795_v46 }
 0x3e7   :  { %v2304_v53 = vpop.eup %2303 }
 0x3e8   :  { %v1793_v35 = vmul.f32 %v2304_v53, %v1789_v55  ;;  %2108 = vmatprep.mubr.bf16.mxu1 %v1799_v14 }
 0x3e9   :  { %v2306_v12 = vpop.eup %2305 }
 0x3ea   :  { %v1794_v7 = vmul.f32 %v2306_v12, %v1790_v16  ;;  %v1797_v61 = vadd.f32 %v1793_v35, %v1761_v34 }
 0x3ec   :  { %v1798_v44 = vadd.f32 %v1794_v7, %v1762_v18 }
 0x3ee   :  { %v1800_v40 = vpack.c.bf16 %v1798_v44, %v1797_v61 }
 0x3f0   :  { %2109 = vmatmul.mubr.bf16.vlgmr.msra.gmra.mrb[104].mxu1 %v1800_v40 }
 0x4c3   :  { %v2110_v19 = vpop.f32.mrb[104].mxu1 }
 0x4c4   :  { %v1906_v49 = vpop.f32.mrb[105].mxu1  ;;  %v1915_v45 = vadd.f32 %v2110_v19, %v2054_v20 }
 0x4c5   :  { %v2111_v1 = vpop.f32.mrb[106].mxu1  ;;  %v1907_v57 = vadd.f32 %v2054_v20, %v1906_v49 }
 0x4c6   :  { %v1918_v36 = vadd.f32 %v2111_v1, %v2054_v20  ;;  %v1909_v42 = vpop.f32.mrb[107].mxu1 }
 0x4c7   :  { %v1910_v2 = vadd.f32 %v2054_v20, %v1909_v42 }
 0x4c8   :  { %v2079_v22 = vpack.c.bf16 %v1918_v36, %v1915_v45 }
 0x4c9   :  { %v2074_v24 = vpack.c.bf16 %v1910_v2, %v1907_v57 }
 0x4ca   :  { %2081 = vst [vmem:[%s3215_s10 + $0x8] sm:$0xff] %v2079_v22  }
 0x4cb   :  { %2075 = vst [vmem:[%s3215_s10] sm:$0xff] %v2074_v24  }

</bundles_post_ra>
